<compile_context>
chip_gen: v6e
topology: v6e:2x2x1
jax: 0.10.0
libtpu: 0.0.40
codegen_flags: <defaults>
</compile_context>

<pallas_src>
import functools

import jax
import jax.numpy as jnp
from jax import lax
from jax.experimental import pallas as pl
from jax.experimental.pallas import tpu as pltpu


# ----------------------------- Pallas kernel ------------------------------ #

def air_predictor_kernel(
    x_ref,        # (B, T, D)        raw input features (batch-major, as given)
    w_x_ref,      # (D, G)           folded embedding+input-gate weights, G = 4H*dirs
    b_x_ref,      # (1, G)           folded bias (b_emb@W_ih + b_ih + b_hh), g-cols x2
    w_hhT_ref,    # (H, 4H)          forward recurrent weights (transposed), g-cols x2
    w_fcT_ref,    # (H*dirs, C_pad)  final FC weight, transposed, lane-padded
    b_fc_ref,     # (1, C_pad)
    out_ref,      # (B, C_pad)
    *,
    seq_len: int,
    batch: int,
    hidden: int,
    bidirectional: bool,
):
    T, B, H = seq_len, batch, hidden
    G = 4 * H * (2 if bidirectional else 1)

    # ---- fused embedding + input-gate projection: ONE matmul for all steps ----
    x2d = x_ref[...].reshape(B * T, x_ref.shape[-1])               # (B*T, D)
    gates_x = (
        jnp.dot(x2d, w_x_ref[...], preferred_element_type=jnp.float32)
        + b_x_ref[...]
    )                                                              # (B*T, G)
    gates3 = gates_x.reshape(B, T, G)                              # batch-major

    w_hhT = w_hhT_ref[...]                                         # (H, 4H)

    def step(gx, h, c):
        # gx: (B, 4H) precomputed input gates (bias folded in, g-cols pre-scaled x2).
        gates = gx + jnp.dot(h, w_hhT, preferred_element_type=jnp.float32)
        # ONE full-width tanh per step:
        #   i/f/o lanes: 0.5*(tanh(0.5*z)+1) == sigmoid(z)
        #   g lanes    : tanh(0.5 * (2*g))   == tanh(g)   (columns pre-scaled by 2)
        th = jnp.tanh(0.5 * gates)
        i = 0.5 * (th[:, 0:H] + 1.0)
        f = 0.5 * (th[:, H:2 * H] + 1.0)
        g = th[:, 2 * H:3 * H]
        o = 0.5 * (th[:, 3 * H:4 * H] + 1.0)
        c_new = f * c + i * g
        h_new = o * jnp.tanh(c_new)
        return h_new, c_new

    h = jnp.zeros((B, H), jnp.float32)
    c = jnp.zeros((B, H), jnp.float32)

    if T <= 16:
        # Fully unrolled: per-step gate slices are recurrence-independent, so the
        # scheduler hoists them off the serial MXU->EUP->VPU chain.
        for t in range(T):
            h, c = step(gates3[:, t, 0:4 * H], h, c)
    else:
        # Longer sequences: leading-axis dynamic index inside a bounded-unroll loop.
        gfwd_tm = jnp.transpose(gates3[:, :, 0:4 * H], (1, 0, 2))  # (T, B, 4H), once

        def body(t, hc):
            h_i, c_i = hc
            return step(gfwd_tm[t], h_i, c_i)

        h, c = lax.fori_loop(0, T, body, (h, c), unroll=4)

    if bidirectional:
        # PyTorch outputs[:, -1, H:] == backward cell's FIRST step (zero state) on
        # x[T-1]; h_prev @ W_hh_b == 0, so only the precomputed input gates are used.
        gb = gates3[:, T - 1, 4 * H:8 * H]                         # (B, 4H)
        thb = jnp.tanh(0.5 * gb)
        ib = 0.5 * (thb[:, 0:H] + 1.0)
        gg = thb[:, 2 * H:3 * H]
        ob = 0.5 * (thb[:, 3 * H:4 * H] + 1.0)
        cb = ib * gg                                               # f * c0 == 0
        hb = ob * jnp.tanh(cb)
        feats = jnp.concatenate([h, hb], axis=-1)                  # (B, 2H)
    else:
        feats = h                                                  # (B, H)

    # ---- final FC (lane-dense padded output) ----
    out_ref[...] = (
        jnp.dot(feats, w_fcT_ref[...], preferred_element_type=jnp.float32)
        + b_fc_ref[...]
    ).astype(out_ref.dtype)


# ------------------- one-time parameter preparation (cold path) ------------ #

def prepare_params(params, *, bidirectional: bool):
    """Fold/fuse/pad weights ONCE so the per-call forward has zero weight ops."""
    H = params["w_hhT_f"].shape[0]
    C = params["b_fc"].shape[-1]
    C_pad = ((C + 127) // 128) * 128
    ndirs = 2 if bidirectional else 1

    if bidirectional:
        w_ihT = jnp.concatenate([params["w_ihT_f"], params["w_ihT_b"]], axis=1)  # (E, 8H)
        b_ih = jnp.concatenate([params["b_f"], params["b_b"]], axis=1)           # (1, 8H)
    else:
        w_ihT = params["w_ihT_f"]                                                # (E, 4H)
        b_ih = params["b_f"]

    # Fold the embedding Linear into the input-gate projection:
    #   (x @ W_embT + b_emb) @ W_ihT + b_ih  ==  x @ (W_embT @ W_ihT) + (b_emb @ W_ihT + b_ih)
    w_x = params["w_embT"] @ w_ihT                   # (D, G)
    b_x = params["b_emb"] @ w_ihT + b_ih             # (1, G)
    w_hhT = params["w_hhT_f"]                        # (H, 4H)

    # Pre-scale g-gate columns by 2 so the kernel uses ONE tanh(0.5*gates) per step.
    def scale_g_cols(w, dirs):
        cols = jnp.ones((w.shape[-1],), w.dtype)
        for d in range(dirs):
            cols = cols.at[d * 4 * H + 2 * H: d * 4 * H + 3 * H].set(2.0)
        return w * cols

    w_x = scale_g_cols(w_x, ndirs)
    b_x = scale_g_cols(b_x, ndirs)
    w_hhT = scale_g_cols(w_hhT, 1)

    # Lane-dense padded FC output; real columns sliced back in the wrapper.
    w_fcT = jnp.pad(params["w_fcT"], ((0, 0), (0, C_pad - C)))
    b_fc = jnp.pad(params["b_fc"], ((0, 0), (0, C_pad - C)))

    kernel_params = {"w_x": w_x, "b_x": b_x, "w_hhT": w_hhT,
                     "w_fcT": w_fcT, "b_fc": b_fc}
    meta = {"hidden": H, "num_classes": C, "c_pad": C_pad}
    return kernel_params, meta


# ------------------------------ hot-path wrapper --------------------------- #

@functools.partial(jax.jit,
                   static_argnames=("bidirectional", "hidden", "num_classes", "c_pad"))
def air_predictor_forward(x, kp, *, bidirectional: bool, hidden: int,
                          num_classes: int, c_pad: int):
    B, T, _ = x.shape
    kernel = functools.partial(
        air_predictor_kernel,
        seq_len=T, batch=B, hidden=hidden, bidirectional=bool(bidirectional),
    )
    vmem = pl.BlockSpec(memory_space=pltpu.MemorySpace.VMEM)
    args = (x, kp["w_x"], kp["b_x"], kp["w_hhT"], kp["w_fcT"], kp["b_fc"])
    out_padded = pl.pallas_call(
        kernel,
        out_shape=jax.ShapeDtypeStruct((B, c_pad), jnp.float32),
        in_specs=[vmem] * len(args),
        out_specs=vmem,
    )(*args)
    return out_padded[:, :num_classes]


# -------------------- deterministic parameter construction ---------------- #

def init_params(key, input_dim, embed_dim, rnn_dim, num_classes, bidirectional):
    ks = jax.random.split(key, 12)
    k_scale = 1.0 / jnp.sqrt(jnp.float32(rnn_dim))

    def u(k, shape, scale):
        return jax.random.uniform(k, shape, jnp.float32, -scale, scale)

    e_scale = 1.0 / jnp.sqrt(jnp.float32(input_dim))
    fc_in = rnn_dim * (2 if bidirectional else 1)
    f_scale = 1.0 / jnp.sqrt(jnp.float32(fc_in))

    return {
        # nn.Linear(input_dim, embed_dim): weight (E, D) -> stored transposed (D, E)
        "w_embT": u(ks[0], (input_dim, embed_dim), e_scale),
        "b_emb": u(ks[1], (1, embed_dim), e_scale),
        # LSTM forward direction: W_ih (4H, E) -> (E, 4H); W_hh (4H, H) -> (H, 4H)
        "w_ihT_f": u(ks[2], (embed_dim, 4 * rnn_dim), k_scale),
        "w_hhT_f": u(ks[3], (rnn_dim, 4 * rnn_dim), k_scale),
        "b_f": u(ks[4], (1, 4 * rnn_dim), k_scale) + u(ks[5], (1, 4 * rnn_dim), k_scale),
        # LSTM backward direction (used only when bidirectional=True)
        "w_ihT_b": u(ks[6], (embed_dim, 4 * rnn_dim), k_scale),
        "w_hhT_b": u(ks[7], (rnn_dim, 4 * rnn_dim), k_scale),
        "b_b": u(ks[8], (1, 4 * rnn_dim), k_scale) + u(ks[9], (1, 4 * rnn_dim), k_scale),
        # nn.Linear(rnn_dim * (bi+1), num_classes): weight (C, fc_in) -> (fc_in, C)
        "w_fcT": u(ks[10], (fc_in, num_classes), f_scale),
        "b_fc": u(ks[11], (1, num_classes), f_scale),
    }


# ------------------------ pure-JAX reference check ------------------------ #

def reference_forward(x, params, *, bidirectional: bool):
    """Straight port of the PyTorch forward (unfused, standard sigmoid), f32."""
    B, T, _ = x.shape
    H = params["w_hhT_f"].shape[0]
    emb = jnp.einsum("btd,de->bte", x, params["w_embT"]) + params["b_emb"][None]

    def cell(x_t, h, c, w_ihT, w_hhT, b):
        g = x_t @ w_ihT + h @ w_hhT + b
        i = jax.nn.sigmoid(g[:, :H])
        f = jax.nn.sigmoid(g[:, H:2 * H])
        gg = jnp.tanh(g[:, 2 * H:3 * H])
        o = jax.nn.sigmoid(g[:, 3 * H:])
        c_new = f * c + i * gg
        return o * jnp.tanh(c_new), c_new

    h = jnp.zeros((B, H), jnp.float32)
    c = jnp.zeros((B, H), jnp.float32)
    for t in range(T):
        h, c = cell(emb[:, t, :], h, c,
                    params["w_ihT_f"], params["w_hhT_f"], params["b_f"])
    if bidirectional:
        # outputs[:, -1, H:] of a batch_first bi-LSTM == backward cell's first
        # step on x[T-1] from zero state.
        hb, _ = cell(emb[:, T - 1, :], jnp.zeros_like(h), jnp.zeros_like(c),
                     params["w_ihT_b"], params["w_hhT_b"], params["b_b"])
        feats = jnp.concatenate([h, hb], axis=-1)
    else:
        feats = h
    return feats @ params["w_fcT"] + params["b_fc"]


# ---------------------------------- main ----------------------------------- #

if __name__ == "__main__":
    B, T = 2, 8
    input_dim, embed_dim, rnn_dim, num_classes = 16, 32, 32, 8
    # fc_dim exists on the module but is unused in its forward; ignored here.

    key = jax.random.PRNGKey(0)
    k_x, k_p1, k_p2 = jax.random.split(key, 3)
    x = jax.random.normal(k_x, (B, T, input_dim), jnp.float32)

    for bidirectional, k_p in ((True, k_p1), (False, k_p2)):
        params = init_params(k_p, input_dim, embed_dim, rnn_dim,
                             num_classes, bidirectional)
        kp, meta = prepare_params(params, bidirectional=bidirectional)  # cold path, once
        out = air_predictor_forward(
            x, kp, bidirectional=bidirectional,
            hidden=meta["hidden"], num_classes=meta["num_classes"],
            c_pad=meta["c_pad"])
        out = jax.block_until_ready(out)
        ref = reference_forward(x, params, bidirectional=bidirectional)
        assert out.shape == (B, num_classes)
        assert jnp.allclose(out, ref, atol=1e-4, rtol=1e-4), (
            f"mismatch (bidirectional={bidirectional}): "
            f"{jnp.max(jnp.abs(out - ref))}")

    print("KERNEL_OK")
</pallas_src>

<mosaic_0001>
module attributes {stable_mosaic.version = 11 : i64} {
  func.func @air_predictor_kernel(%arg0: memref<2x8x16xf32, #tpu.memory_space<vmem>>, %arg1: memref<16x256xf32, #tpu.memory_space<vmem>>, %arg2: memref<1x256xf32, #tpu.memory_space<vmem>>, %arg3: memref<32x128xf32, #tpu.memory_space<vmem>>, %arg4: memref<64x128xf32, #tpu.memory_space<vmem>>, %arg5: memref<1x128xf32, #tpu.memory_space<vmem>>, %arg6: memref<2x128xf32, #tpu.memory_space<vmem>>) attributes {dimension_semantics = [], scalar_prefetch = 0 : i64, scratch_operands = 0 : i64, tpu.core_type = #tpu.core_type<tc>} {
    %c0 = arith.constant 0 : index
    %c0_0 = arith.constant 0 : index
    %c0_1 = arith.constant 0 : index
    %0 = vector.load %arg0[%c0, %c0_0, %c0_1] : memref<2x8x16xf32, #tpu.memory_space<vmem>>, vector<2x8x16xf32>
    %1 = vector.shape_cast %0 : vector<2x8x16xf32> to vector<16x16xf32>
    %c0_2 = arith.constant 0 : index
    %c0_3 = arith.constant 0 : index
    %2 = vector.load %arg1[%c0_2, %c0_3] : memref<16x256xf32, #tpu.memory_space<vmem>>, vector<16x256xf32>
    %cst = arith.constant dense<0.000000e+00> : vector<16x256xf32>
    %3 = tpu.matmul %1, %2, %cst {dimension_numbers = #tpu.dot_dimension_numbers<[1], [0], [0], [1], [0, 0, 1, 1], [], []>} : vector<16x16xf32>, vector<16x256xf32>, vector<16x256xf32> -> vector<16x256xf32>
    %c0_4 = arith.constant 0 : index
    %c0_5 = arith.constant 0 : index
    %4 = vector.load %arg2[%c0_4, %c0_5] : memref<1x256xf32, #tpu.memory_space<vmem>>, vector<1x256xf32>
    %5 = vector.broadcast %4 : vector<1x256xf32> to vector<16x256xf32>
    %6 = arith.addf %3, %5 : vector<16x256xf32>
    %7 = vector.shape_cast %6 : vector<16x256xf32> to vector<2x8x256xf32>
    %c0_6 = arith.constant 0 : index
    %c0_7 = arith.constant 0 : index
    %8 = vector.load %arg3[%c0_6, %c0_7] : memref<32x128xf32, #tpu.memory_space<vmem>>, vector<32x128xf32>
    %cst_8 = arith.constant 0.000000e+00 : f32
    %9 = vector.broadcast %cst_8 : f32 to vector<2x32xf32>
    %cst_9 = arith.constant 0.000000e+00 : f32
    %10 = vector.broadcast %cst_9 : f32 to vector<2x32xf32>
    %11 = vector.extract_strided_slice %7 {offsets = [0, 0, 0], sizes = [2, 1, 128], strides = [1, 1, 1]} : vector<2x8x256xf32> to vector<2x1x128xf32>
    %12 = vector.shape_cast %11 : vector<2x1x128xf32> to vector<2x128xf32>
    %cst_10 = arith.constant dense<0.000000e+00> : vector<2x128xf32>
    %13 = tpu.matmul %9, %8, %cst_10 {dimension_numbers = #tpu.dot_dimension_numbers<[1], [0], [0], [1], [0, 0, 1, 1], [], []>} : vector<2x32xf32>, vector<32x128xf32>, vector<2x128xf32> -> vector<2x128xf32>
    %14 = arith.addf %12, %13 : vector<2x128xf32>
    %cst_11 = arith.constant 5.000000e-01 : f32
    %15 = vector.broadcast %cst_11 : f32 to vector<2x128xf32>
    %16 = arith.mulf %15, %14 : vector<2x128xf32>
    %17 = math.tanh %16 : vector<2x128xf32>
    %18 = vector.extract_strided_slice %17 {offsets = [0, 0], sizes = [2, 32], strides = [1, 1]} : vector<2x128xf32> to vector<2x32xf32>
    %cst_12 = arith.constant 1.000000e+00 : f32
    %19 = vector.broadcast %cst_12 : f32 to vector<2x32xf32>
    %20 = arith.addf %18, %19 : vector<2x32xf32>
    %cst_13 = arith.constant 5.000000e-01 : f32
    %21 = vector.broadcast %cst_13 : f32 to vector<2x32xf32>
    %22 = arith.mulf %21, %20 : vector<2x32xf32>
    %23 = vector.extract_strided_slice %17 {offsets = [0, 32], sizes = [2, 32], strides = [1, 1]} : vector<2x128xf32> to vector<2x32xf32>
    %cst_14 = arith.constant 1.000000e+00 : f32
    %24 = vector.broadcast %cst_14 : f32 to vector<2x32xf32>
    %25 = arith.addf %23, %24 : vector<2x32xf32>
    %cst_15 = arith.constant 5.000000e-01 : f32
    %26 = vector.broadcast %cst_15 : f32 to vector<2x32xf32>
    %27 = arith.mulf %26, %25 : vector<2x32xf32>
    %28 = vector.extract_strided_slice %17 {offsets = [0, 64], sizes = [2, 32], strides = [1, 1]} : vector<2x128xf32> to vector<2x32xf32>
    %29 = vector.extract_strided_slice %17 {offsets = [0, 96], sizes = [2, 32], strides = [1, 1]} : vector<2x128xf32> to vector<2x32xf32>
    %cst_16 = arith.constant 1.000000e+00 : f32
    %30 = vector.broadcast %cst_16 : f32 to vector<2x32xf32>
    %31 = arith.addf %29, %30 : vector<2x32xf32>
    %cst_17 = arith.constant 5.000000e-01 : f32
    %32 = vector.broadcast %cst_17 : f32 to vector<2x32xf32>
    %33 = arith.mulf %32, %31 : vector<2x32xf32>
    %34 = arith.mulf %27, %10 : vector<2x32xf32>
    %35 = arith.mulf %22, %28 : vector<2x32xf32>
    %36 = arith.addf %34, %35 : vector<2x32xf32>
    %37 = math.tanh %36 : vector<2x32xf32>
    %38 = arith.mulf %33, %37 : vector<2x32xf32>
    %39 = vector.extract_strided_slice %7 {offsets = [0, 1, 0], sizes = [2, 1, 128], strides = [1, 1, 1]} : vector<2x8x256xf32> to vector<2x1x128xf32>
    %40 = vector.shape_cast %39 : vector<2x1x128xf32> to vector<2x128xf32>
    %cst_18 = arith.constant dense<0.000000e+00> : vector<2x128xf32>
    %41 = tpu.matmul %38, %8, %cst_18 {dimension_numbers = #tpu.dot_dimension_numbers<[1], [0], [0], [1], [0, 0, 1, 1], [], []>} : vector<2x32xf32>, vector<32x128xf32>, vector<2x128xf32> -> vector<2x128xf32>
    %42 = arith.addf %40, %41 : vector<2x128xf32>
    %cst_19 = arith.constant 5.000000e-01 : f32
    %43 = vector.broadcast %cst_19 : f32 to vector<2x128xf32>
    %44 = arith.mulf %43, %42 : vector<2x128xf32>
    %45 = math.tanh %44 : vector<2x128xf32>
    %46 = vector.extract_strided_slice %45 {offsets = [0, 0], sizes = [2, 32], strides = [1, 1]} : vector<2x128xf32> to vector<2x32xf32>
    %cst_20 = arith.constant 1.000000e+00 : f32
    %47 = vector.broadcast %cst_20 : f32 to vector<2x32xf32>
    %48 = arith.addf %46, %47 : vector<2x32xf32>
    %cst_21 = arith.constant 5.000000e-01 : f32
    %49 = vector.broadcast %cst_21 : f32 to vector<2x32xf32>
    %50 = arith.mulf %49, %48 : vector<2x32xf32>
    %51 = vector.extract_strided_slice %45 {offsets = [0, 32], sizes = [2, 32], strides = [1, 1]} : vector<2x128xf32> to vector<2x32xf32>
    %cst_22 = arith.constant 1.000000e+00 : f32
    %52 = vector.broadcast %cst_22 : f32 to vector<2x32xf32>
    %53 = arith.addf %51, %52 : vector<2x32xf32>
    %cst_23 = arith.constant 5.000000e-01 : f32
    %54 = vector.broadcast %cst_23 : f32 to vector<2x32xf32>
    %55 = arith.mulf %54, %53 : vector<2x32xf32>
    %56 = vector.extract_strided_slice %45 {offsets = [0, 64], sizes = [2, 32], strides = [1, 1]} : vector<2x128xf32> to vector<2x32xf32>
    %57 = vector.extract_strided_slice %45 {offsets = [0, 96], sizes = [2, 32], strides = [1, 1]} : vector<2x128xf32> to vector<2x32xf32>
    %cst_24 = arith.constant 1.000000e+00 : f32
    %58 = vector.broadcast %cst_24 : f32 to vector<2x32xf32>
    %59 = arith.addf %57, %58 : vector<2x32xf32>
    %cst_25 = arith.constant 5.000000e-01 : f32
    %60 = vector.broadcast %cst_25 : f32 to vector<2x32xf32>
    %61 = arith.mulf %60, %59 : vector<2x32xf32>
    %62 = arith.mulf %55, %36 : vector<2x32xf32>
    %63 = arith.mulf %50, %56 : vector<2x32xf32>
    %64 = arith.addf %62, %63 : vector<2x32xf32>
    %65 = math.tanh %64 : vector<2x32xf32>
    %66 = arith.mulf %61, %65 : vector<2x32xf32>
    %67 = vector.extract_strided_slice %7 {offsets = [0, 2, 0], sizes = [2, 1, 128], strides = [1, 1, 1]} : vector<2x8x256xf32> to vector<2x1x128xf32>
    %68 = vector.shape_cast %67 : vector<2x1x128xf32> to vector<2x128xf32>
    %cst_26 = arith.constant dense<0.000000e+00> : vector<2x128xf32>
    %69 = tpu.matmul %66, %8, %cst_26 {dimension_numbers = #tpu.dot_dimension_numbers<[1], [0], [0], [1], [0, 0, 1, 1], [], []>} : vector<2x32xf32>, vector<32x128xf32>, vector<2x128xf32> -> vector<2x128xf32>
    %70 = arith.addf %68, %69 : vector<2x128xf32>
    %cst_27 = arith.constant 5.000000e-01 : f32
    %71 = vector.broadcast %cst_27 : f32 to vector<2x128xf32>
    %72 = arith.mulf %71, %70 : vector<2x128xf32>
    %73 = math.tanh %72 : vector<2x128xf32>
    %74 = vector.extract_strided_slice %73 {offsets = [0, 0], sizes = [2, 32], strides = [1, 1]} : vector<2x128xf32> to vector<2x32xf32>
    %cst_28 = arith.constant 1.000000e+00 : f32
    %75 = vector.broadcast %cst_28 : f32 to vector<2x32xf32>
    %76 = arith.addf %74, %75 : vector<2x32xf32>
    %cst_29 = arith.constant 5.000000e-01 : f32
    %77 = vector.broadcast %cst_29 : f32 to vector<2x32xf32>
    %78 = arith.mulf %77, %76 : vector<2x32xf32>
    %79 = vector.extract_strided_slice %73 {offsets = [0, 32], sizes = [2, 32], strides = [1, 1]} : vector<2x128xf32> to vector<2x32xf32>
    %cst_30 = arith.constant 1.000000e+00 : f32
    %80 = vector.broadcast %cst_30 : f32 to vector<2x32xf32>
    %81 = arith.addf %79, %80 : vector<2x32xf32>
    %cst_31 = arith.constant 5.000000e-01 : f32
    %82 = vector.broadcast %cst_31 : f32 to vector<2x32xf32>
    %83 = arith.mulf %82, %81 : vector<2x32xf32>
    %84 = vector.extract_strided_slice %73 {offsets = [0, 64], sizes = [2, 32], strides = [1, 1]} : vector<2x128xf32> to vector<2x32xf32>
    %85 = vector.extract_strided_slice %73 {offsets = [0, 96], sizes = [2, 32], strides = [1, 1]} : vector<2x128xf32> to vector<2x32xf32>
    %cst_32 = arith.constant 1.000000e+00 : f32
    %86 = vector.broadcast %cst_32 : f32 to vector<2x32xf32>
    %87 = arith.addf %85, %86 : vector<2x32xf32>
    %cst_33 = arith.constant 5.000000e-01 : f32
    %88 = vector.broadcast %cst_33 : f32 to vector<2x32xf32>
    %89 = arith.mulf %88, %87 : vector<2x32xf32>
    %90 = arith.mulf %83, %64 : vector<2x32xf32>
    %91 = arith.mulf %78, %84 : vector<2x32xf32>
    %92 = arith.addf %90, %91 : vector<2x32xf32>
    %93 = math.tanh %92 : vector<2x32xf32>
    %94 = arith.mulf %89, %93 : vector<2x32xf32>
    %95 = vector.extract_strided_slice %7 {offsets = [0, 3, 0], sizes = [2, 1, 128], strides = [1, 1, 1]} : vector<2x8x256xf32> to vector<2x1x128xf32>
    %96 = vector.shape_cast %95 : vector<2x1x128xf32> to vector<2x128xf32>
    %cst_34 = arith.constant dense<0.000000e+00> : vector<2x128xf32>
    %97 = tpu.matmul %94, %8, %cst_34 {dimension_numbers = #tpu.dot_dimension_numbers<[1], [0], [0], [1], [0, 0, 1, 1], [], []>} : vector<2x32xf32>, vector<32x128xf32>, vector<2x128xf32> -> vector<2x128xf32>
    %98 = arith.addf %96, %97 : vector<2x128xf32>
    %cst_35 = arith.constant 5.000000e-01 : f32
    %99 = vector.broadcast %cst_35 : f32 to vector<2x128xf32>
    %100 = arith.mulf %99, %98 : vector<2x128xf32>
    %101 = math.tanh %100 : vector<2x128xf32>
    %102 = vector.extract_strided_slice %101 {offsets = [0, 0], sizes = [2, 32], strides = [1, 1]} : vector<2x128xf32> to vector<2x32xf32>
    %cst_36 = arith.constant 1.000000e+00 : f32
    %103 = vector.broadcast %cst_36 : f32 to vector<2x32xf32>
    %104 = arith.addf %102, %103 : vector<2x32xf32>
    %cst_37 = arith.constant 5.000000e-01 : f32
    %105 = vector.broadcast %cst_37 : f32 to vector<2x32xf32>
    %106 = arith.mulf %105, %104 : vector<2x32xf32>
    %107 = vector.extract_strided_slice %101 {offsets = [0, 32], sizes = [2, 32], strides = [1, 1]} : vector<2x128xf32> to vector<2x32xf32>
    %cst_38 = arith.constant 1.000000e+00 : f32
    %108 = vector.broadcast %cst_38 : f32 to vector<2x32xf32>
    %109 = arith.addf %107, %108 : vector<2x32xf32>
    %cst_39 = arith.constant 5.000000e-01 : f32
    %110 = vector.broadcast %cst_39 : f32 to vector<2x32xf32>
    %111 = arith.mulf %110, %109 : vector<2x32xf32>
    %112 = vector.extract_strided_slice %101 {offsets = [0, 64], sizes = [2, 32], strides = [1, 1]} : vector<2x128xf32> to vector<2x32xf32>
    %113 = vector.extract_strided_slice %101 {offsets = [0, 96], sizes = [2, 32], strides = [1, 1]} : vector<2x128xf32> to vector<2x32xf32>
    %cst_40 = arith.constant 1.000000e+00 : f32
    %114 = vector.broadcast %cst_40 : f32 to vector<2x32xf32>
    %115 = arith.addf %113, %114 : vector<2x32xf32>
    %cst_41 = arith.constant 5.000000e-01 : f32
    %116 = vector.broadcast %cst_41 : f32 to vector<2x32xf32>
    %117 = arith.mulf %116, %115 : vector<2x32xf32>
    %118 = arith.mulf %111, %92 : vector<2x32xf32>
    %119 = arith.mulf %106, %112 : vector<2x32xf32>
    %120 = arith.addf %118, %119 : vector<2x32xf32>
    %121 = math.tanh %120 : vector<2x32xf32>
    %122 = arith.mulf %117, %121 : vector<2x32xf32>
    %123 = vector.extract_strided_slice %7 {offsets = [0, 4, 0], sizes = [2, 1, 128], strides = [1, 1, 1]} : vector<2x8x256xf32> to vector<2x1x128xf32>
    %124 = vector.shape_cast %123 : vector<2x1x128xf32> to vector<2x128xf32>
    %cst_42 = arith.constant dense<0.000000e+00> : vector<2x128xf32>
    %125 = tpu.matmul %122, %8, %cst_42 {dimension_numbers = #tpu.dot_dimension_numbers<[1], [0], [0], [1], [0, 0, 1, 1], [], []>} : vector<2x32xf32>, vector<32x128xf32>, vector<2x128xf32> -> vector<2x128xf32>
    %126 = arith.addf %124, %125 : vector<2x128xf32>
    %cst_43 = arith.constant 5.000000e-01 : f32
    %127 = vector.broadcast %cst_43 : f32 to vector<2x128xf32>
    %128 = arith.mulf %127, %126 : vector<2x128xf32>
    %129 = math.tanh %128 : vector<2x128xf32>
    %130 = vector.extract_strided_slice %129 {offsets = [0, 0], sizes = [2, 32], strides = [1, 1]} : vector<2x128xf32> to vector<2x32xf32>
    %cst_44 = arith.constant 1.000000e+00 : f32
    %131 = vector.broadcast %cst_44 : f32 to vector<2x32xf32>
    %132 = arith.addf %130, %131 : vector<2x32xf32>
    %cst_45 = arith.constant 5.000000e-01 : f32
    %133 = vector.broadcast %cst_45 : f32 to vector<2x32xf32>
    %134 = arith.mulf %133, %132 : vector<2x32xf32>
    %135 = vector.extract_strided_slice %129 {offsets = [0, 32], sizes = [2, 32], strides = [1, 1]} : vector<2x128xf32> to vector<2x32xf32>
    %cst_46 = arith.constant 1.000000e+00 : f32
    %136 = vector.broadcast %cst_46 : f32 to vector<2x32xf32>
    %137 = arith.addf %135, %136 : vector<2x32xf32>
    %cst_47 = arith.constant 5.000000e-01 : f32
    %138 = vector.broadcast %cst_47 : f32 to vector<2x32xf32>
    %139 = arith.mulf %138, %137 : vector<2x32xf32>
    %140 = vector.extract_strided_slice %129 {offsets = [0, 64], sizes = [2, 32], strides = [1, 1]} : vector<2x128xf32> to vector<2x32xf32>
    %141 = vector.extract_strided_slice %129 {offsets = [0, 96], sizes = [2, 32], strides = [1, 1]} : vector<2x128xf32> to vector<2x32xf32>
    %cst_48 = arith.constant 1.000000e+00 : f32
    %142 = vector.broadcast %cst_48 : f32 to vector<2x32xf32>
    %143 = arith.addf %141, %142 : vector<2x32xf32>
    %cst_49 = arith.constant 5.000000e-01 : f32
    %144 = vector.broadcast %cst_49 : f32 to vector<2x32xf32>
    %145 = arith.mulf %144, %143 : vector<2x32xf32>
    %146 = arith.mulf %139, %120 : vector<2x32xf32>
    %147 = arith.mulf %134, %140 : vector<2x32xf32>
    %148 = arith.addf %146, %147 : vector<2x32xf32>
    %149 = math.tanh %148 : vector<2x32xf32>
    %150 = arith.mulf %145, %149 : vector<2x32xf32>
    %151 = vector.extract_strided_slice %7 {offsets = [0, 5, 0], sizes = [2, 1, 128], strides = [1, 1, 1]} : vector<2x8x256xf32> to vector<2x1x128xf32>
    %152 = vector.shape_cast %151 : vector<2x1x128xf32> to vector<2x128xf32>
    %cst_50 = arith.constant dense<0.000000e+00> : vector<2x128xf32>
    %153 = tpu.matmul %150, %8, %cst_50 {dimension_numbers = #tpu.dot_dimension_numbers<[1], [0], [0], [1], [0, 0, 1, 1], [], []>} : vector<2x32xf32>, vector<32x128xf32>, vector<2x128xf32> -> vector<2x128xf32>
    %154 = arith.addf %152, %153 : vector<2x128xf32>
    %cst_51 = arith.constant 5.000000e-01 : f32
    %155 = vector.broadcast %cst_51 : f32 to vector<2x128xf32>
    %156 = arith.mulf %155, %154 : vector<2x128xf32>
    %157 = math.tanh %156 : vector<2x128xf32>
    %158 = vector.extract_strided_slice %157 {offsets = [0, 0], sizes = [2, 32], strides = [1, 1]} : vector<2x128xf32> to vector<2x32xf32>
    %cst_52 = arith.constant 1.000000e+00 : f32
    %159 = vector.broadcast %cst_52 : f32 to vector<2x32xf32>
    %160 = arith.addf %158, %159 : vector<2x32xf32>
    %cst_53 = arith.constant 5.000000e-01 : f32
    %161 = vector.broadcast %cst_53 : f32 to vector<2x32xf32>
    %162 = arith.mulf %161, %160 : vector<2x32xf32>
    %163 = vector.extract_strided_slice %157 {offsets = [0, 32], sizes = [2, 32], strides = [1, 1]} : vector<2x128xf32> to vector<2x32xf32>
    %cst_54 = arith.constant 1.000000e+00 : f32
    %164 = vector.broadcast %cst_54 : f32 to vector<2x32xf32>
    %165 = arith.addf %163, %164 : vector<2x32xf32>
    %cst_55 = arith.constant 5.000000e-01 : f32
    %166 = vector.broadcast %cst_55 : f32 to vector<2x32xf32>
    %167 = arith.mulf %166, %165 : vector<2x32xf32>
    %168 = vector.extract_strided_slice %157 {offsets = [0, 64], sizes = [2, 32], strides = [1, 1]} : vector<2x128xf32> to vector<2x32xf32>
    %169 = vector.extract_strided_slice %157 {offsets = [0, 96], sizes = [2, 32], strides = [1, 1]} : vector<2x128xf32> to vector<2x32xf32>
    %cst_56 = arith.constant 1.000000e+00 : f32
    %170 = vector.broadcast %cst_56 : f32 to vector<2x32xf32>
    %171 = arith.addf %169, %170 : vector<2x32xf32>
    %cst_57 = arith.constant 5.000000e-01 : f32
    %172 = vector.broadcast %cst_57 : f32 to vector<2x32xf32>
    %173 = arith.mulf %172, %171 : vector<2x32xf32>
    %174 = arith.mulf %167, %148 : vector<2x32xf32>
    %175 = arith.mulf %162, %168 : vector<2x32xf32>
    %176 = arith.addf %174, %175 : vector<2x32xf32>
    %177 = math.tanh %176 : vector<2x32xf32>
    %178 = arith.mulf %173, %177 : vector<2x32xf32>
    %179 = vector.extract_strided_slice %7 {offsets = [0, 6, 0], sizes = [2, 1, 128], strides = [1, 1, 1]} : vector<2x8x256xf32> to vector<2x1x128xf32>
    %180 = vector.shape_cast %179 : vector<2x1x128xf32> to vector<2x128xf32>
    %cst_58 = arith.constant dense<0.000000e+00> : vector<2x128xf32>
    %181 = tpu.matmul %178, %8, %cst_58 {dimension_numbers = #tpu.dot_dimension_numbers<[1], [0], [0], [1], [0, 0, 1, 1], [], []>} : vector<2x32xf32>, vector<32x128xf32>, vector<2x128xf32> -> vector<2x128xf32>
    %182 = arith.addf %180, %181 : vector<2x128xf32>
    %cst_59 = arith.constant 5.000000e-01 : f32
    %183 = vector.broadcast %cst_59 : f32 to vector<2x128xf32>
    %184 = arith.mulf %183, %182 : vector<2x128xf32>
    %185 = math.tanh %184 : vector<2x128xf32>
    %186 = vector.extract_strided_slice %185 {offsets = [0, 0], sizes = [2, 32], strides = [1, 1]} : vector<2x128xf32> to vector<2x32xf32>
    %cst_60 = arith.constant 1.000000e+00 : f32
    %187 = vector.broadcast %cst_60 : f32 to vector<2x32xf32>
    %188 = arith.addf %186, %187 : vector<2x32xf32>
    %cst_61 = arith.constant 5.000000e-01 : f32
    %189 = vector.broadcast %cst_61 : f32 to vector<2x32xf32>
    %190 = arith.mulf %189, %188 : vector<2x32xf32>
    %191 = vector.extract_strided_slice %185 {offsets = [0, 32], sizes = [2, 32], strides = [1, 1]} : vector<2x128xf32> to vector<2x32xf32>
    %cst_62 = arith.constant 1.000000e+00 : f32
    %192 = vector.broadcast %cst_62 : f32 to vector<2x32xf32>
    %193 = arith.addf %191, %192 : vector<2x32xf32>
    %cst_63 = arith.constant 5.000000e-01 : f32
    %194 = vector.broadcast %cst_63 : f32 to vector<2x32xf32>
    %195 = arith.mulf %194, %193 : vector<2x32xf32>
    %196 = vector.extract_strided_slice %185 {offsets = [0, 64], sizes = [2, 32], strides = [1, 1]} : vector<2x128xf32> to vector<2x32xf32>
    %197 = vector.extract_strided_slice %185 {offsets = [0, 96], sizes = [2, 32], strides = [1, 1]} : vector<2x128xf32> to vector<2x32xf32>
    %cst_64 = arith.constant 1.000000e+00 : f32
    %198 = vector.broadcast %cst_64 : f32 to vector<2x32xf32>
    %199 = arith.addf %197, %198 : vector<2x32xf32>
    %cst_65 = arith.constant 5.000000e-01 : f32
    %200 = vector.broadcast %cst_65 : f32 to vector<2x32xf32>
    %201 = arith.mulf %200, %199 : vector<2x32xf32>
    %202 = arith.mulf %195, %176 : vector<2x32xf32>
    %203 = arith.mulf %190, %196 : vector<2x32xf32>
    %204 = arith.addf %202, %203 : vector<2x32xf32>
    %205 = math.tanh %204 : vector<2x32xf32>
    %206 = arith.mulf %201, %205 : vector<2x32xf32>
    %207 = vector.extract_strided_slice %7 {offsets = [0, 7, 0], sizes = [2, 1, 128], strides = [1, 1, 1]} : vector<2x8x256xf32> to vector<2x1x128xf32>
    %208 = vector.shape_cast %207 : vector<2x1x128xf32> to vector<2x128xf32>
    %cst_66 = arith.constant dense<0.000000e+00> : vector<2x128xf32>
    %209 = tpu.matmul %206, %8, %cst_66 {dimension_numbers = #tpu.dot_dimension_numbers<[1], [0], [0], [1], [0, 0, 1, 1], [], []>} : vector<2x32xf32>, vector<32x128xf32>, vector<2x128xf32> -> vector<2x128xf32>
    %210 = arith.addf %208, %209 : vector<2x128xf32>
    %cst_67 = arith.constant 5.000000e-01 : f32
    %211 = vector.broadcast %cst_67 : f32 to vector<2x128xf32>
    %212 = arith.mulf %211, %210 : vector<2x128xf32>
    %213 = math.tanh %212 : vector<2x128xf32>
    %214 = vector.extract_strided_slice %213 {offsets = [0, 0], sizes = [2, 32], strides = [1, 1]} : vector<2x128xf32> to vector<2x32xf32>
    %cst_68 = arith.constant 1.000000e+00 : f32
    %215 = vector.broadcast %cst_68 : f32 to vector<2x32xf32>
    %216 = arith.addf %214, %215 : vector<2x32xf32>
    %cst_69 = arith.constant 5.000000e-01 : f32
    %217 = vector.broadcast %cst_69 : f32 to vector<2x32xf32>
    %218 = arith.mulf %217, %216 : vector<2x32xf32>
    %219 = vector.extract_strided_slice %213 {offsets = [0, 32], sizes = [2, 32], strides = [1, 1]} : vector<2x128xf32> to vector<2x32xf32>
    %cst_70 = arith.constant 1.000000e+00 : f32
    %220 = vector.broadcast %cst_70 : f32 to vector<2x32xf32>
    %221 = arith.addf %219, %220 : vector<2x32xf32>
    %cst_71 = arith.constant 5.000000e-01 : f32
    %222 = vector.broadcast %cst_71 : f32 to vector<2x32xf32>
    %223 = arith.mulf %222, %221 : vector<2x32xf32>
    %224 = vector.extract_strided_slice %213 {offsets = [0, 64], sizes = [2, 32], strides = [1, 1]} : vector<2x128xf32> to vector<2x32xf32>
    %225 = vector.extract_strided_slice %213 {offsets = [0, 96], sizes = [2, 32], strides = [1, 1]} : vector<2x128xf32> to vector<2x32xf32>
    %cst_72 = arith.constant 1.000000e+00 : f32
    %226 = vector.broadcast %cst_72 : f32 to vector<2x32xf32>
    %227 = arith.addf %225, %226 : vector<2x32xf32>
    %cst_73 = arith.constant 5.000000e-01 : f32
    %228 = vector.broadcast %cst_73 : f32 to vector<2x32xf32>
    %229 = arith.mulf %228, %227 : vector<2x32xf32>
    %230 = arith.mulf %223, %204 : vector<2x32xf32>
    %231 = arith.mulf %218, %224 : vector<2x32xf32>
    %232 = arith.addf %230, %231 : vector<2x32xf32>
    %233 = math.tanh %232 : vector<2x32xf32>
    %234 = arith.mulf %229, %233 : vector<2x32xf32>
    %235 = vector.extract_strided_slice %7 {offsets = [0, 7, 128], sizes = [2, 1, 128], strides = [1, 1, 1]} : vector<2x8x256xf32> to vector<2x1x128xf32>
    %236 = vector.shape_cast %235 : vector<2x1x128xf32> to vector<2x128xf32>
    %cst_74 = arith.constant 5.000000e-01 : f32
    %237 = vector.broadcast %cst_74 : f32 to vector<2x128xf32>
    %238 = arith.mulf %237, %236 : vector<2x128xf32>
    %239 = math.tanh %238 : vector<2x128xf32>
    %240 = vector.extract_strided_slice %239 {offsets = [0, 0], sizes = [2, 32], strides = [1, 1]} : vector<2x128xf32> to vector<2x32xf32>
    %cst_75 = arith.constant 1.000000e+00 : f32
    %241 = vector.broadcast %cst_75 : f32 to vector<2x32xf32>
    %242 = arith.addf %240, %241 : vector<2x32xf32>
    %cst_76 = arith.constant 5.000000e-01 : f32
    %243 = vector.broadcast %cst_76 : f32 to vector<2x32xf32>
    %244 = arith.mulf %243, %242 : vector<2x32xf32>
    %245 = vector.extract_strided_slice %239 {offsets = [0, 64], sizes = [2, 32], strides = [1, 1]} : vector<2x128xf32> to vector<2x32xf32>
    %246 = vector.extract_strided_slice %239 {offsets = [0, 96], sizes = [2, 32], strides = [1, 1]} : vector<2x128xf32> to vector<2x32xf32>
    %cst_77 = arith.constant 1.000000e+00 : f32
    %247 = vector.broadcast %cst_77 : f32 to vector<2x32xf32>
    %248 = arith.addf %246, %247 : vector<2x32xf32>
    %cst_78 = arith.constant 5.000000e-01 : f32
    %249 = vector.broadcast %cst_78 : f32 to vector<2x32xf32>
    %250 = arith.mulf %249, %248 : vector<2x32xf32>
    %251 = arith.mulf %244, %245 : vector<2x32xf32>
    %252 = math.tanh %251 : vector<2x32xf32>
    %253 = arith.mulf %250, %252 : vector<2x32xf32>
    %254 = tpu.concatenate %234, %253 in 1 : vector<2x32xf32>, vector<2x32xf32> -> vector<2x64xf32>
    %c0_79 = arith.constant 0 : index
    %c0_80 = arith.constant 0 : index
    %255 = vector.load %arg4[%c0_79, %c0_80] : memref<64x128xf32, #tpu.memory_space<vmem>>, vector<64x128xf32>
    %cst_81 = arith.constant dense<0.000000e+00> : vector<2x128xf32>
    %256 = tpu.matmul %254, %255, %cst_81 {dimension_numbers = #tpu.dot_dimension_numbers<[1], [0], [0], [1], [0, 0, 1, 1], [], []>} : vector<2x64xf32>, vector<64x128xf32>, vector<2x128xf32> -> vector<2x128xf32>
    %c0_82 = arith.constant 0 : index
    %c0_83 = arith.constant 0 : index
    %257 = vector.load %arg5[%c0_82, %c0_83] : memref<1x128xf32, #tpu.memory_space<vmem>>, vector<1x128xf32>
    %258 = vector.broadcast %257 : vector<1x128xf32> to vector<2x128xf32>
    %259 = arith.addf %256, %258 : vector<2x128xf32>
    %c0_84 = arith.constant 0 : index
    %c0_85 = arith.constant 0 : index
    %260 = vector.load %arg6[%c0_84, %c0_85] : memref<2x128xf32, #tpu.memory_space<vmem>>, vector<2x128xf32>
    tpu.vector_store %arg6[%c0_84, %c0_85], %259 {strides = array<i32>} : memref<2x128xf32, #tpu.memory_space<vmem>>, vector<2x128xf32>,
    return
  }
}

</mosaic_0001>

<bundles_post_ra>
// kernel: air_predictor_forward.1
= control target key start
LH: loop header
LB: loop body
LE: loop exit
PB: predicated region body
PF: predicated region fallthrough
CT: control target
= control target key end

     0   :  { %11 = vsyncpa [#allocation3], 0  ;;  %s2058_s0 = inlined_call_operand.hbm [shape: f32[2,8,16], index: 0, kind: input, shape index: {}]   ;;  %s2059_s1 = inlined_call_operand.hbm [shape: f32[16,256], index: 1, kind: input, shape index: {}]   ;;  %s2060_s2 = inlined_call_operand.vmem [shape: f32[1,256], index: 2, kind: input, shape index: {}]   ;;  %s2061_s3 = inlined_call_operand.hbm [shape: f32[32,128], index: 3, kind: input, shape index: {}]   ;;  %s2062_s4 = inlined_call_operand.hbm [shape: f32[64,128], index: 4, kind: input, shape index: {}]   ;;  %s2063_s5 = inlined_call_operand.vmem [shape: f32[1,128], index: 5, kind: input, shape index: {}]   ;;  %s2064_s6 = inlined_call_operand.hbm [shape: f32[2,128], index: 6, kind: output, shape index: {}]  }
   0x1   :  { %12 = vsyncpa [#allocation6], 0 }
   0x2   :  { %13 = vsyncpa [#allocation9], 0 }
   0x3   :  { %14 = vsyncpa [#allocation4], 0  ;;  %s1766_s21 = smov [#allocation5]  }
   0x4   :  { %s32_s22 = sshll.u32 %s1766_s21, 4  ;;  %s33_s22 = int_to_ptr.vmem [resolvable:$true] %s32_s22 }
   0x5   :  { %s1666_s23 = scalar_lea.vmem %s33_s22, 512  ;;  %p1671_p1 = scmp.lt.s32.totalorder %s33_s22, %s33_s22 }
   0x6   :  { %p1667_p0 = scmp.ne.s32.totalorder %s33_s22, %s1666_s23  ;;  %p1672_p2 = scmp.lt.s32.totalorder %s1666_s23, %s1666_s23 }
   0x8   :  { %p1673_p3 = por %p1672_p2, %p1671_p1 }
   0xa   :  { %p1674_p4 = pnand %p1673_p3, %p1667_p0 }
   0xc   :  { %1677 = shalt.err (!%p1674_p4)
}
   0xd   :  { %s1767_s24 = smov 256   ;;  %s1768_s25 = smov 16  }
   0xe   :  { %38 = dma.hbm_to_vmem [thread:$0]  %s2059_s1, 512, %s33_s22, [#allocation6], %s1767_s24, %s1767_s24, %s1768_s25  }
   0xf   :  { %s1769_s28 = smov [#allocation2]  }
  0x10   :  { %s20_s29 = sshll.u32 %s1769_s28, 4  ;;  %s21_s29 = int_to_ptr.vmem [resolvable:$true] %s20_s29 }
  0x11   :  { %s1686_s30 = scalar_lea.vmem %s21_s29, 256  ;;  %p1691_p6 = scmp.lt.s32.totalorder %s21_s29, %s21_s29 }
  0x12   :  { %p1687_p5 = scmp.ne.s32.totalorder %s21_s29, %s1686_s30  ;;  %p1692_p7 = scmp.lt.s32.totalorder %s1686_s30, %s1686_s30 }
  0x14   :  { %p1693_p8 = por %p1692_p7, %p1691_p6 }
  0x16   :  { %p1694_p9 = pnand %p1693_p8, %p1687_p5 }
  0x18   :  { %1697 = shalt.err (!%p1694_p9)
}
  0x19   :  { %s1770_s7 = smov 128   ;;  %s1771_s8 = smov 8  }
  0x1a   :  { %26 = dma.hbm_to_vmem [thread:$0]  %s2058_s0, 256, %s21_s29, [#allocation3], %s1770_s7, %s1770_s7, %s1771_s8  }
  0x1b   :  { %s1772_s11 = smov [#allocation7]   ;;  %s1773_s13 = smov [#allocation8]  }
  0x1c   :  { %s46_s12 = sshll.u32 %s1772_s11, 4  ;;  %s58_s1 = sshll.u32 %s1773_s13, 4  ;;  %s47_s12 = int_to_ptr.vmem [resolvable:$true] %s46_s12  ;;  %s59_s1 = int_to_ptr.vmem [resolvable:$true] %s58_s1 }
  0x1d   :  { %s1706_s14 = scalar_lea.vmem %s47_s12, 512  ;;  %p1711_p11 = scmp.lt.s32.totalorder %s47_s12, %s47_s12 }
  0x1e   :  { %p1707_p10 = scmp.ne.s32.totalorder %s47_s12, %s1706_s14  ;;  %p1712_p12 = scmp.lt.s32.totalorder %s1706_s14, %s1706_s14 }
  0x20   :  { %p1713_p13 = por %p1712_p12, %p1711_p11 }
  0x22   :  { %p1714_p0 = pnand %p1713_p13, %p1707_p10 }
  0x24   :  { %1717 = shalt.err (!%p1714_p0)
}
  0x25   :  { %52 = dma.hbm_to_vmem [thread:$0]  %s2061_s3, 512, %s47_s12, [#allocation6], %s1770_s7, %s1770_s7, %s1771_s8  }
  0x26   :  { %s1726_s17 = scalar_lea.vmem %s59_s1, 1024  ;;  %p1731_p2 = scmp.lt.s32.totalorder %s59_s1, %s59_s1 }
  0x27   :  { %p1727_p1 = scmp.ne.s32.totalorder %s59_s1, %s1726_s17  ;;  %p1732_p3 = scmp.lt.s32.totalorder %s1726_s17, %s1726_s17 }
  0x29   :  { %p1733_p4 = por %p1732_p3, %p1731_p2 }
  0x2b   :  { %p1734_p5 = pnand %p1733_p4, %p1727_p1 }
  0x2d   :  { %1737 = shalt.err (!%p1734_p5)
}
  0x2e   :  { %64 = dma.hbm_to_vmem [thread:$0]  %s2062_s4, 1024, %s59_s1, [#allocation9], %s1770_s7, %s1770_s7, %s1771_s8  }
  0x2f   :  { %1758 = dma.done.wait [#allocation3], 256  }
  0x30   :  { %1759 = vsyncadd [#allocation3], 4294967040 }
  0x31   :  { %1760 = dma.done.wait [#allocation6], 1024  }
  0x32   :  { %1761 = vsyncadd [#allocation6], 4294966272 }
  0x33   :  { %1762 = dma.done.wait [#allocation9], 1024  }
  0x34   :  { %1763 = vsyncadd [#allocation9], 4294966272  ;;  %v1774_v0 = vmov 0.0   ;;  %vm1775_vm0 = vmmov 0   ;;  %v84_v1 = vld [vmem:[#allocation5 + $0x18] sm:$0xff]  ;;  %v83_v2 = vld [vmem:[#allocation5 + $0x10] sm:$0xff]  ;;  %v87_v11 = vlaneseq }
  0x35   :  { %168 = vmatprep.mubr.f32.mxu0 %v1774_v0  ;;  %1487 = vmatprep.subr.mxu1 %v1774_v0  ;;  %v82_v3 = vld [vmem:[#allocation5 + $0x8] sm:$0xff]  ;;  %v81_v4 = vld [vmem:[#allocation5] sm:$0xff]  ;;  %v1831_v5 = vld [vmem:[#allocation7 + $0x18] sm:$0xff]  ;;  %vm97_vm1 = vcmask 130048   ;;  %s1777_s19 = smov 32   ;;  %vm310_vm2 = vcmask 1041409  }
  0x36   :  { %1495 = vmatprep.mubr.msk.f32.mxu1 %vm1775_vm0, %v1774_v0  ;;  %132 = vmatprep.subr.mxu0 %v84_v1  ;;  %v79_v6 = vld [vmem:[#allocation2] sm:$0xff]  ;;  %v80_v8 = vld [vmem:[#allocation2 + $0x8] sm:$0xff]  ;;  %v1843_v9 = vld [vmem:[#allocation7 + $0x8] sm:$0xff]  ;;  %v1872_v12 = vshrl.u32 %v87_v11, 7  ;;  %vm185_vm3 = vcmask 261120   ;;  %s1778_s20 = smov 96  }
  0x37   :  { %133 = vmatpush1.msra.mxu0 %v83_v2  ;;  %1488 = vmatpush3.msra.mxu1 %v1831_v5  ;;  %v1834_v7 = vld [vmem:[#allocation7 + $0x10] sm:$0xff]  ;;  %v1850_v10 = vld [vmem:[#allocation7] sm:$0xff]  ;;  %vm1310_vm4 = vcmask 1040384   ;;  %vm1314_vm5 = vcmask 523264   ;;  %s1779_s23 = smov [#allocation10]  }
  0x38   :  { %134 = vmatprep.subr.mxu0 %v82_v3  ;;  %1489 = vmatprep.subr.mxu1 %v1774_v0  ;;  %v89_v14 = vsub.s32 0, %v1872_v12  ;;  %v1878_v15 = vld [vmem:[%s2060_s2] sm:$0x3]  ;;  %s1776_s2 = smov 64   ;;  %s1394_s24 = sshll.u32 %s1779_s23, 4  ;;  %s1395_s24 = int_to_ptr.vmem [resolvable:$true] %s1394_s24 }
  0x39   :  { %135 = vmatpush1.msra.mxu0 %v81_v4  ;;  %1490 = vmatpush3.msra.mxu1 %v1834_v7  ;;  %s1738_s25 = scalar_lea.vmem %s1395_s24, 32  ;;  %p1743_p7 = scmp.lt.s32.totalorder %s1395_s24, %s1395_s24 }
  0x3a   :  { %1405 = vmatmul.mubr.msk.f32.vlgmr.msra.gmra.mxu0 %vm97_vm1, %v79_v6  ;;  %1465 = vmatprep.subr.mxu0 %v1774_v0  ;;  %v90_v18 = vrot.slane %v1878_v15, %v89_v14  ;;  %p1739_p6 = scmp.ne.s32.totalorder %s1395_s24, %s1738_s25  ;;  %p1744_p8 = scmp.lt.s32.totalorder %s1738_s25, %s1738_s25 }
  0x3b   :  { %1466 = vmatpush3.msra.mxu0 %v1831_v5  ;;  %174 = vmatprep.mubr.f32.mxu0 %v1774_v0 }
  0x3c   :  { %1467 = vmatprep.subr.mxu0 %v1774_v0  ;;  %1491 = vmatprep.subr.mxu1 %v1774_v0  ;;  %p1745_p9 = por %p1744_p8, %p1743_p7 }
  0x3d   :  { %1468 = vmatpush3.msra.mxu0 %v1834_v7  ;;  %1492 = vmatpush3.msra.mxu1 %v1843_v9 }
  0x3e   :  { %1406 = vmatmul.mubr.msk.f32.gmra.mxu0 %vm97_vm1, %v80_v8  ;;  %1469 = vmatprep.subr.mxu0 %v1774_v0  ;;  %p1746_p10 = pnand %p1745_p9, %p1739_p6 }
  0x3f   :  { %1470 = vmatpush3.msra.mxu0 %v1843_v9  ;;  %1473 = vmatprep.mubr.msk.f32.mxu0 %vm1775_vm0, %v1774_v0 }
  0x40   :  { %1471 = vmatprep.subr.mxu0 %v1774_v0  ;;  %1493 = vmatprep.subr.mxu1 %v1774_v0 }
  0x41   :  { %1472 = vmatpush3.msra.mxu0 %v1850_v10  ;;  %1494 = vmatpush3.msra.mxu1 %v1850_v10 }
  0x42   :  { %1474 = vmatmul.mubr.f32.vlgmr.msra.gmra.mxu0 %v1774_v0  ;;  %1476 = vmatprep.subr.mxu0 %v1774_v0 }
  0x43   :  { %1477 = vmatpush3.msra.mxu0 %v1831_v5  ;;  %1484 = vmatprep.mubr.msk.f32.mxu0 %vm1775_vm0, %v1774_v0 }
  0x44   :  { %1478 = vmatprep.subr.mxu0 %v1774_v0  ;;  %1509 = vmatprep.subr.mxu1 %v1774_v0 }
  0x45   :  { %1479 = vmatpush3.msra.mxu0 %v1834_v7 }
  0x46   :  { %1480 = vmatprep.subr.mxu0 %v1774_v0 }
  0x47   :  { %1481 = vmatpush3.msra.mxu0 %v1843_v9 }
  0x48   :  { %1482 = vmatprep.subr.mxu0 %v1774_v0 }
  0x49   :  { %1483 = vmatpush3.msra.mxu0 %v1850_v10 }
  0x4a   :  { %1498 = vmatprep.subr.mxu0 %v1774_v0 }
  0xfa   :  { %v170_v13 = vpop.f32.mrf.mxu0 }
  0xfb   :  { %v1885_v21 = vadd.f32 %v170_v13, %v90_v18 }
  0xfc   :  { %v1880_v16 = vpop.f32.mrf.mxu0 }
  0xfe   :  { %v176_v17 = vpop.f32.mrf.mxu0 }
  0xff   :  { %v1887_v22 = vadd.f32 %v176_v17, %v90_v18 }
 0x100   :  { %v1883_v19 = vpop.f32.mrf.mxu0 }
 0x102   :  { %v255_v20 = vpop.f32.mrf.mxu0 }
 0x103   :  { %v260_v23 = vrot.slane %v255_v20, 1  ;;  %v263_v25 = vadd.f32 %v255_v20, %v1885_v21 }
 0x104   :  { %v1475_v24 = vpop.f32.mrf.mxu0 }
 0x105   :  { %v264_v26 = vadd.f32 %v260_v23, %v1887_v22  ;;  %v265_v28 = vmul.f32 0.5, %v263_v25 }
 0x107   :  { %v266_v27 = vmul.f32 0.5, %v264_v26 }
 0x109   :  { %1586 = vtanh.f32 %v266_v27 }
 0x10a   :  { %1588 = vtanh.f32 %v265_v28 }
 0x116   :  { %v1587_v29 = vpop.eup %1586 }
 0x117   :  { %279 = vrot.lane.b32.xlu0 %v1587_v29, %s1776_s2  ;;  %v1589_v30 = vpop.eup %1588  ;;  %v270_v31 = vadd.f32 1.0, %v1587_v29 }
 0x118   :  { %v269_v33 = vadd.f32 1.0, %v1589_v30 }
 0x119   :  { %v272_v32 = vmul.f32 0.5, %v270_v31 }
 0x11a   :  { %v271_v36 = vmul.f32 0.5, %v269_v33 }
 0x11b   :  { %277 = vrot.lane.b32.xlu0 %v1589_v30, %s1776_s2  ;;  %v274_v39 = vmul.f32 0.0, %v272_v32 }
 0x11c   :  { %v273_v42 = vmul.f32 0.0, %v271_v36 }
 0x189   :  { %v280_v34 = vpop.permute.xlu0 %279 }
 0x18a   :  { %v284_v35 = vmul.f32 %v280_v34, %v272_v32 }
 0x18c   :  { %289 = vrot.lane.b32.xlu1 %v284_v35, %s1777_s19 }
 0x18d   :  { %v278_v37 = vpop.permute.xlu0 %277 }
 0x18e   :  { %v283_v38 = vmul.f32 %v278_v37, %v271_v36 }
 0x190   :  { %287 = vrot.lane.b32.xlu1 %v283_v38, %s1777_s19 }
 0x1fe   :  { %v290_v40 = vpop.permute.xlu1 %289 }
 0x1ff   :  { %v294_v41 = vadd.f32 %v290_v40, %v274_v39 }
 0x201   :  { %1590 = vtanh.f32 %v294_v41  ;;  %v403_v13 = vrot.slane %v294_v41, 7 }
 0x202   :  { %v288_v43 = vpop.permute.xlu1 %287 }
 0x203   :  { %v293_v44 = vadd.f32 %v288_v43, %v273_v42 }
 0x205   :  { %1592 = vtanh.f32 %v293_v44  ;;  %v402_v14 = vrot.slane %v293_v44, 7 }
 0x20e   :  { %v1591_v45 = vpop.eup %1590 }
 0x20f   :  { %301 = vrot.lane.b32.xlu0 %v1591_v45, %s1776_s2 }
 0x212   :  { %v1593_v46 = vpop.eup %1592 }
 0x213   :  { %299 = vrot.lane.b32.xlu1 %v1593_v46, %s1776_s2 }
 0x281   :  { %v302_v47 = vpop.permute.xlu0 %301 }
 0x282   :  { %v306_v48 = vmul.f32 %v302_v47, %v272_v32 }
 0x284   :  { %v309_v50 = vrot.slane %v306_v48, 7 }
 0x285   :  { %v300_v49 = vpop.permute.xlu1 %299 }
 0x286   :  { %v305_v51 = vmul.f32 %v300_v49, %v271_v36 }
 0x288   :  { %v311_v52 = vsel %vm310_vm2, %v309_v50, %v305_v51 }
 0x289   :  { %312 = vrot.lane.b32.xlu0 %v311_v52, %s1777_s19 }
 0x2fb   :  { %v313_v53 = vpop.permute.xlu0 %312 }
 0x2fc   :  { %1485 = vmatmul.mubr.msk.f32.vlgmr.msra.gmra.mxu0 %vm185_vm3, %v313_v53 }
 0x2fd   :  { %1499 = vmatpush3.msra.mxu0 %v1831_v5  ;;  %1506 = vmatprep.mubr.msk.f32.mxu0 %vm1775_vm0, %v1774_v0 }
 0x2fe   :  { %1500 = vmatprep.subr.mxu0 %v1774_v0 }
 0x2ff   :  { %1501 = vmatpush3.msra.mxu0 %v1834_v7 }
 0x300   :  { %1502 = vmatprep.subr.mxu0 %v1774_v0 }
 0x301   :  { %1503 = vmatpush3.msra.mxu0 %v1843_v9 }
 0x302   :  { %1504 = vmatprep.subr.mxu0 %v1774_v0 }
 0x303   :  { %1505 = vmatpush3.msra.mxu0 %v1850_v10 }
 0x304   :  { %1520 = vmatprep.subr.mxu0 %v1774_v0 }
 0x3bc   :  { %v382_v54 = vpop.f32.mrf.mxu0 }
 0x3bd   :  { %v387_v55 = vrot.slane %v382_v54, 7  ;;  %v391_v56 = vadd.f32 %v382_v54, %v1887_v22 }
 0x3be   :  { %v1486_v57 = vpop.f32.mrf.mxu0 }
 0x3bf   :  { %v390_v58 = vadd.f32 %v387_v55, %v1885_v21  ;;  %v393_v59 = vmul.f32 0.5, %v391_v56 }
 0x3c1   :  { %v392_v60 = vmul.f32 0.5, %v390_v58  ;;  %1594 = vtanh.f32 %v393_v59 }
 0x3c3   :  { %1596 = vtanh.f32 %v392_v60 }
 0x3ce   :  { %v1595_v61 = vpop.eup %1594 }
 0x3cf   :  { %412 = vrot.lane.b32.xlu0 %v1595_v61, %s1776_s2  ;;  %v397_v63 = vadd.f32 1.0, %v1595_v61 }
 0x3d0   :  { %v1597_v62 = vpop.eup %1596 }
 0x3d1   :  { %410 = vrot.lane.b32.xlu1 %v1597_v62, %s1776_s2  ;;  %v396_v1 = vadd.f32 1.0, %v1597_v62  ;;  %v399_v2 = vmul.f32 0.5, %v397_v63 }
 0x3d3   :  { %v398_v6 = vmul.f32 0.5, %v396_v1  ;;  %v407_v17 = vmul.f32 %v403_v13, %v399_v2 }
 0x3d5   :  { %v406_v23 = vmul.f32 %v402_v14, %v398_v6 }
 0x441   :  { %v413_v3 = vpop.permute.xlu0 %412 }
 0x442   :  { %v417_v4 = vmul.f32 %v413_v3, %v399_v2 }
 0x443   :  { %v411_v8 = vpop.permute.xlu1 %410 }
 0x444   :  { %v416_v11 = vmul.f32 %v411_v8, %v398_v6  ;;  %422 = vrot.lane.b32.xlu0 %v417_v4, %s1777_s19 }
 0x446   :  { %420 = vrot.lane.b32.xlu1 %v416_v11, %s1777_s19 }
 0x4b6   :  { %v423_v18 = vpop.permute.xlu0 %422 }
 0x4b7   :  { %v427_v20 = vadd.f32 %v423_v18, %v407_v17 }
 0x4b8   :  { %v421_v24 = vpop.permute.xlu1 %420 }
 0x4b9   :  { %1598 = vtanh.f32 %v427_v20  ;;  %v426_v25 = vadd.f32 %v421_v24, %v406_v23  ;;  %v536_v54 = vrot.slane %v427_v20, 7 }
 0x4bb   :  { %1600 = vtanh.f32 %v426_v25  ;;  %v535_v53 = vrot.slane %v426_v25, 7 }
 0x4c6   :  { %v1599_v26 = vpop.eup %1598 }
 0x4c7   :  { %434 = vrot.lane.b32.xlu0 %v1599_v26, %s1776_s2 }
 0x4c8   :  { %v1601_v27 = vpop.eup %1600 }
 0x4c9   :  { %432 = vrot.lane.b32.xlu1 %v1601_v27, %s1776_s2 }
 0x539   :  { %v435_v28 = vpop.permute.xlu0 %434 }
 0x53a   :  { %v439_v31 = vmul.f32 %v435_v28, %v399_v2 }
 0x53b   :  { %v433_v29 = vpop.permute.xlu1 %432 }
 0x53c   :  { %v438_v30 = vmul.f32 %v433_v29, %v398_v6 }
 0x53e   :  { %v442_v32 = vrot.slane %v438_v30, 1 }
 0x540   :  { %v443_v33 = vsel %vm310_vm2, %v439_v31, %v442_v32 }
 0x541   :  { %444 = vrot.lane.b32.xlu1 %v443_v33, %s1777_s19 }
 0x5b3   :  { %v445_v34 = vpop.permute.xlu1 %444 }
 0x5b4   :  { %1496 = vmatmul.mubr.msk.f32.vlgmr.msra.gmra.mxu1 %vm185_vm3, %v445_v34 }
 0x5b5   :  { %1510 = vmatpush3.msra.mxu1 %v1831_v5  ;;  %1517 = vmatprep.mubr.msk.f32.mxu1 %vm1775_vm0, %v1774_v0 }
 0x5b6   :  { %1511 = vmatprep.subr.mxu1 %v1774_v0 }
 0x5b7   :  { %1512 = vmatpush3.msra.mxu1 %v1834_v7 }
 0x5b8   :  { %1513 = vmatprep.subr.mxu1 %v1774_v0 }
 0x5b9   :  { %1514 = vmatpush3.msra.mxu1 %v1843_v9 }
 0x5ba   :  { %1515 = vmatprep.subr.mxu1 %v1774_v0 }
 0x5bb   :  { %1516 = vmatpush3.msra.mxu1 %v1850_v10 }
 0x5bc   :  { %1531 = vmatprep.subr.mxu1 %v1774_v0 }
 0x674   :  { %v514_v35 = vpop.f32.mrf.mxu1 }
 0x675   :  { %v519_v36 = vrot.slane %v514_v35, 6  ;;  %v520_v37 = vrot.slane %v514_v35, 7 }
 0x676   :  { %v1497_v38 = vpop.f32.mrf.mxu1 }
 0x677   :  { %v523_v39 = vadd.f32 %v519_v36, %v1885_v21  ;;  %v524_v40 = vadd.f32 %v520_v37, %v1887_v22 }
 0x679   :  { %v525_v41 = vmul.f32 0.5, %v523_v39  ;;  %v526_v42 = vmul.f32 0.5, %v524_v40 }
 0x67b   :  { %1602 = vtanh.f32 %v525_v41 }
 0x67c   :  { %1604 = vtanh.f32 %v526_v42 }
 0x688   :  { %v1603_v43 = vpop.eup %1602 }
 0x689   :  { %v1605_v44 = vpop.eup %1604  ;;  %543 = vrot.lane.b32.xlu0 %v1603_v43, %s1776_s2  ;;  %v529_v45 = vadd.f32 1.0, %v1603_v43 }
 0x68a   :  { %545 = vrot.lane.b32.xlu1 %v1605_v44, %s1776_s2  ;;  %v530_v46 = vadd.f32 1.0, %v1605_v44 }
 0x68b   :  { %v531_v47 = vmul.f32 0.5, %v529_v45 }
 0x68c   :  { %v532_v48 = vmul.f32 0.5, %v530_v46 }
 0x68d   :  { %v539_v55 = vmul.f32 %v535_v53, %v531_v47 }
 0x68e   :  { %v540_v56 = vmul.f32 %v536_v54, %v532_v48 }
 0x6fb   :  { %v544_v49 = vpop.permute.xlu0 %543 }
 0x6fc   :  { %v546_v50 = vpop.permute.xlu1 %545  ;;  %v549_v51 = vmul.f32 %v544_v49, %v531_v47 }
 0x6fd   :  { %v550_v52 = vmul.f32 %v546_v50, %v532_v48 }
 0x6fe   :  { %553 = vrot.lane.b32.xlu0 %v549_v51, %s1777_s19 }
 0x6ff   :  { %555 = vrot.lane.b32.xlu1 %v550_v52, %s1777_s19 }
 0x770   :  { %v554_v57 = vpop.permute.xlu0 %553 }
 0x771   :  { %v556_v58 = vpop.permute.xlu1 %555  ;;  %v559_v59 = vadd.f32 %v554_v57, %v539_v55 }
 0x772   :  { %v560_v60 = vadd.f32 %v556_v58, %v540_v56 }
 0x773   :  { %1606 = vtanh.f32 %v559_v59  ;;  %v669_v36 = vrot.slane %v559_v59, 7 }
 0x774   :  { %1608 = vtanh.f32 %v560_v60  ;;  %v670_v37 = vrot.slane %v560_v60, 7 }
 0x780   :  { %v1607_v61 = vpop.eup %1606 }
 0x781   :  { %v1609_v62 = vpop.eup %1608  ;;  %565 = vrot.lane.b32.xlu0 %v1607_v61, %s1776_s2 }
 0x782   :  { %567 = vrot.lane.b32.xlu1 %v1609_v62, %s1776_s2 }
 0x7f3   :  { %v566_v63 = vpop.permute.xlu0 %565 }
 0x7f4   :  { %v568_v1 = vpop.permute.xlu1 %567  ;;  %v571_v2 = vmul.f32 %v566_v63, %v531_v47 }
 0x7f5   :  { %v572_v3 = vmul.f32 %v568_v1, %v532_v48 }
 0x7f6   :  { %v575_v4 = vrot.slane %v571_v2, 2 }
 0x7f7   :  { %v576_v6 = vrot.slane %v572_v3, 1 }
 0x7f9   :  { %v577_v8 = vsel %vm310_vm2, %v576_v6, %v575_v4 }
 0x7fa   :  { %578 = vrot.lane.b32.xlu0 %v577_v8, %s1777_s19 }
 0x86c   :  { %v579_v11 = vpop.permute.xlu0 %578 }
 0x86d   :  { %1507 = vmatmul.mubr.msk.f32.vlgmr.msra.gmra.mxu0 %vm185_vm3, %v579_v11 }
 0x86e   :  { %1521 = vmatpush3.msra.mxu0 %v1831_v5  ;;  %1528 = vmatprep.mubr.msk.f32.mxu0 %vm1775_vm0, %v1774_v0 }
 0x86f   :  { %1522 = vmatprep.subr.mxu0 %v1774_v0 }
 0x870   :  { %1523 = vmatpush3.msra.mxu0 %v1834_v7 }
 0x871   :  { %1524 = vmatprep.subr.mxu0 %v1774_v0 }
 0x872   :  { %1525 = vmatpush3.msra.mxu0 %v1843_v9 }
 0x873   :  { %1526 = vmatprep.subr.mxu0 %v1774_v0 }
 0x874   :  { %1527 = vmatpush3.msra.mxu0 %v1850_v10 }
 0x875   :  { %1542 = vmatprep.subr.mxu0 %v1774_v0 }
 0x92d   :  { %v648_v13 = vpop.f32.mrf.mxu0 }
 0x92e   :  { %v653_v14 = vrot.slane %v648_v13, 5  ;;  %v654_v17 = vrot.slane %v648_v13, 6 }
 0x92f   :  { %v1508_v18 = vpop.f32.mrf.mxu0 }
 0x930   :  { %v657_v20 = vadd.f32 %v653_v14, %v1885_v21  ;;  %v658_v23 = vadd.f32 %v654_v17, %v1887_v22 }
 0x932   :  { %v659_v24 = vmul.f32 0.5, %v657_v20  ;;  %v660_v25 = vmul.f32 0.5, %v658_v23 }
 0x934   :  { %1610 = vtanh.f32 %v659_v24 }
 0x935   :  { %1612 = vtanh.f32 %v660_v25 }
 0x941   :  { %v1611_v26 = vpop.eup %1610 }
 0x942   :  { %v1613_v27 = vpop.eup %1612  ;;  %677 = vrot.lane.b32.xlu1 %v1611_v26, %s1776_s2  ;;  %v663_v28 = vadd.f32 1.0, %v1611_v26 }
 0x943   :  { %679 = vrot.lane.b32.xlu0 %v1613_v27, %s1776_s2  ;;  %v664_v29 = vadd.f32 1.0, %v1613_v27 }
 0x944   :  { %v665_v30 = vmul.f32 0.5, %v663_v28 }
 0x945   :  { %v666_v31 = vmul.f32 0.5, %v664_v29 }
 0x946   :  { %v673_v38 = vmul.f32 %v669_v36, %v665_v30 }
 0x947   :  { %v674_v39 = vmul.f32 %v670_v37, %v666_v31 }
 0x9b4   :  { %v678_v32 = vpop.permute.xlu1 %677 }
 0x9b5   :  { %v680_v33 = vpop.permute.xlu0 %679  ;;  %v683_v34 = vmul.f32 %v678_v32, %v665_v30 }
 0x9b6   :  { %v684_v35 = vmul.f32 %v680_v33, %v666_v31 }
 0x9b7   :  { %687 = vrot.lane.b32.xlu1 %v683_v34, %s1777_s19 }
 0x9b8   :  { %689 = vrot.lane.b32.xlu0 %v684_v35, %s1777_s19 }
 0xa29   :  { %v688_v40 = vpop.permute.xlu1 %687 }
 0xa2a   :  { %v690_v41 = vpop.permute.xlu0 %689  ;;  %v693_v42 = vadd.f32 %v688_v40, %v673_v38 }
 0xa2b   :  { %v694_v43 = vadd.f32 %v690_v41, %v674_v39 }
 0xa2c   :  { %1614 = vtanh.f32 %v693_v42  ;;  %v803_v14 = vrot.slane %v693_v42, 7 }
 0xa2d   :  { %1616 = vtanh.f32 %v694_v43  ;;  %v804_v17 = vrot.slane %v694_v43, 7 }
 0xa39   :  { %v1615_v44 = vpop.eup %1614 }
 0xa3a   :  { %v1617_v45 = vpop.eup %1616  ;;  %699 = vrot.lane.b32.xlu1 %v1615_v44, %s1776_s2 }
 0xa3b   :  { %701 = vrot.lane.b32.xlu0 %v1617_v45, %s1776_s2 }
 0xaac   :  { %v700_v46 = vpop.permute.xlu1 %699 }
 0xaad   :  { %v702_v47 = vpop.permute.xlu0 %701  ;;  %v705_v48 = vmul.f32 %v700_v46, %v665_v30 }
 0xaae   :  { %v706_v49 = vmul.f32 %v702_v47, %v666_v31 }
 0xaaf   :  { %v709_v50 = vrot.slane %v705_v48, 3 }
 0xab0   :  { %v710_v51 = vrot.slane %v706_v49, 2 }
 0xab2   :  { %v711_v52 = vsel %vm310_vm2, %v710_v51, %v709_v50 }
 0xab3   :  { %712 = vrot.lane.b32.xlu1 %v711_v52, %s1777_s19 }
 0xb25   :  { %v713_v53 = vpop.permute.xlu1 %712 }
 0xb26   :  { %1518 = vmatmul.mubr.msk.f32.vlgmr.msra.gmra.mxu1 %vm185_vm3, %v713_v53 }
 0xb27   :  { %1532 = vmatpush3.msra.mxu1 %v1831_v5  ;;  %1539 = vmatprep.mubr.msk.f32.mxu1 %vm1775_vm0, %v1774_v0 }
 0xb28   :  { %1533 = vmatprep.subr.mxu1 %v1774_v0 }
 0xb29   :  { %1534 = vmatpush3.msra.mxu1 %v1834_v7 }
 0xb2a   :  { %1535 = vmatprep.subr.mxu1 %v1774_v0 }
 0xb2b   :  { %1536 = vmatpush3.msra.mxu1 %v1843_v9 }
 0xb2c   :  { %1537 = vmatprep.subr.mxu1 %v1774_v0 }
 0xb2d   :  { %1538 = vmatpush3.msra.mxu1 %v1850_v10 }
 0xb2e   :  { %1553 = vmatprep.subr.mxu1 %v1774_v0 }
 0xbe6   :  { %v782_v54 = vpop.f32.mrf.mxu1 }
 0xbe7   :  { %v787_v55 = vrot.slane %v782_v54, 4  ;;  %v788_v56 = vrot.slane %v782_v54, 5 }
 0xbe8   :  { %v1519_v57 = vpop.f32.mrf.mxu1 }
 0xbe9   :  { %v791_v58 = vadd.f32 %v787_v55, %v1885_v21  ;;  %v792_v59 = vadd.f32 %v788_v56, %v1887_v22 }
 0xbeb   :  { %v793_v60 = vmul.f32 0.5, %v791_v58  ;;  %v794_v61 = vmul.f32 0.5, %v792_v59 }
 0xbed   :  { %1618 = vtanh.f32 %v793_v60 }
 0xbee   :  { %1620 = vtanh.f32 %v794_v61 }
 0xbfa   :  { %v1619_v62 = vpop.eup %1618 }
 0xbfb   :  { %v1621_v63 = vpop.eup %1620  ;;  %811 = vrot.lane.b32.xlu0 %v1619_v62, %s1776_s2  ;;  %v797_v1 = vadd.f32 1.0, %v1619_v62 }
 0xbfc   :  { %813 = vrot.lane.b32.xlu1 %v1621_v63, %s1776_s2  ;;  %v798_v2 = vadd.f32 1.0, %v1621_v63 }
 0xbfd   :  { %v799_v3 = vmul.f32 0.5, %v797_v1 }
 0xbfe   :  { %v800_v4 = vmul.f32 0.5, %v798_v2 }
 0xbff   :  { %v807_v18 = vmul.f32 %v803_v14, %v799_v3 }
 0xc00   :  { %v808_v20 = vmul.f32 %v804_v17, %v800_v4 }
 0xc6d   :  { %v812_v6 = vpop.permute.xlu0 %811 }
 0xc6e   :  { %v814_v8 = vpop.permute.xlu1 %813  ;;  %v817_v11 = vmul.f32 %v812_v6, %v799_v3 }
 0xc6f   :  { %v818_v13 = vmul.f32 %v814_v8, %v800_v4 }
 0xc70   :  { %821 = vrot.lane.b32.xlu0 %v817_v11, %s1777_s19 }
 0xc71   :  { %823 = vrot.lane.b32.xlu1 %v818_v13, %s1777_s19 }
 0xce2   :  { %v822_v23 = vpop.permute.xlu0 %821 }
 0xce3   :  { %v824_v24 = vpop.permute.xlu1 %823  ;;  %v827_v25 = vadd.f32 %v822_v23, %v807_v18 }
 0xce4   :  { %v828_v26 = vadd.f32 %v824_v24, %v808_v20 }
 0xce5   :  { %1622 = vtanh.f32 %v827_v25  ;;  %v937_v51 = vrot.slane %v827_v25, 7 }
 0xce6   :  { %1624 = vtanh.f32 %v828_v26  ;;  %v938_v52 = vrot.slane %v828_v26, 7 }
 0xcf2   :  { %v1623_v27 = vpop.eup %1622 }
 0xcf3   :  { %v1625_v28 = vpop.eup %1624  ;;  %833 = vrot.lane.b32.xlu0 %v1623_v27, %s1776_s2 }
 0xcf4   :  { %835 = vrot.lane.b32.xlu1 %v1625_v28, %s1776_s2 }
 0xd65   :  { %v834_v29 = vpop.permute.xlu0 %833 }
 0xd66   :  { %v836_v30 = vpop.permute.xlu1 %835  ;;  %v839_v31 = vmul.f32 %v834_v29, %v799_v3 }
 0xd67   :  { %v840_v32 = vmul.f32 %v836_v30, %v800_v4 }
 0xd68   :  { %v843_v33 = vrot.slane %v839_v31, 4 }
 0xd69   :  { %v844_v34 = vrot.slane %v840_v32, 3 }
 0xd6b   :  { %v845_v35 = vsel %vm310_vm2, %v844_v34, %v843_v33 }
 0xd6c   :  { %846 = vrot.lane.b32.xlu0 %v845_v35, %s1777_s19 }
 0xdde   :  { %v847_v36 = vpop.permute.xlu0 %846 }
 0xddf   :  { %1529 = vmatmul.mubr.msk.f32.vlgmr.msra.gmra.mxu0 %vm185_vm3, %v847_v36 }
 0xde0   :  { %1543 = vmatpush3.msra.mxu0 %v1831_v5  ;;  %1550 = vmatprep.mubr.msk.f32.mxu0 %vm1775_vm0, %v1774_v0 }
 0xde1   :  { %1544 = vmatprep.subr.mxu0 %v1774_v0 }
 0xde2   :  { %1545 = vmatpush3.msra.mxu0 %v1834_v7 }
 0xde3   :  { %1546 = vmatprep.subr.mxu0 %v1774_v0 }
 0xde4   :  { %1547 = vmatpush3.msra.mxu0 %v1843_v9 }
 0xde5   :  { %1548 = vmatprep.subr.mxu0 %v1774_v0 }
 0xde6   :  { %1549 = vmatpush3.msra.mxu0 %v1850_v10 }
 0xe9f   :  { %v916_v37 = vpop.f32.mrf.mxu0 }
 0xea0   :  { %v921_v38 = vrot.slane %v916_v37, 3  ;;  %v922_v39 = vrot.slane %v916_v37, 4 }
 0xea1   :  { %v1530_v40 = vpop.f32.mrf.mxu0 }
 0xea2   :  { %v925_v5 = vadd.f32 %v921_v38, %v1885_v21  ;;  %v926_v41 = vadd.f32 %v922_v39, %v1887_v22 }
 0xea4   :  { %v927_v42 = vmul.f32 0.5, %v925_v5  ;;  %v928_v43 = vmul.f32 0.5, %v926_v41 }
 0xea6   :  { %1626 = vtanh.f32 %v927_v42 }
 0xea7   :  { %1628 = vtanh.f32 %v928_v43 }
 0xeb3   :  { %v1627_v7 = vpop.eup %1626 }
 0xeb4   :  { %v1629_v44 = vpop.eup %1628  ;;  %945 = vrot.lane.b32.xlu1 %v1627_v7, %s1776_s2  ;;  %v931_v9 = vadd.f32 1.0, %v1627_v7 }
 0xeb5   :  { %947 = vrot.lane.b32.xlu0 %v1629_v44, %s1776_s2  ;;  %v932_v10 = vadd.f32 1.0, %v1629_v44 }
 0xeb6   :  { %v933_v45 = vmul.f32 0.5, %v931_v9 }
 0xeb7   :  { %v934_v46 = vmul.f32 0.5, %v932_v10 }
 0xeb8   :  { %v941_v53 = vmul.f32 %v937_v51, %v933_v45 }
 0xeb9   :  { %v942_v54 = vmul.f32 %v938_v52, %v934_v46 }
 0xf26   :  { %v946_v47 = vpop.permute.xlu1 %945 }
 0xf27   :  { %v948_v48 = vpop.permute.xlu0 %947  ;;  %v951_v49 = vmul.f32 %v946_v47, %v933_v45 }
 0xf28   :  { %v952_v50 = vmul.f32 %v948_v48, %v934_v46  ;;  %v93_v48 = vsub.s32 1, %v1872_v12 }
 0xf29   :  { %955 = vrot.lane.b32.xlu1 %v951_v49, %s1777_s19 }
 0xf2a   :  { %957 = vrot.lane.b32.xlu0 %v952_v50, %s1777_s19  ;;  %v94_v50 = vrot.slane %v1878_v15, %v93_v48 }
 0xf9b   :  { %v956_v55 = vpop.permute.xlu1 %955 }
 0xf9c   :  { %v958_v56 = vpop.permute.xlu0 %957  ;;  %v961_v57 = vadd.f32 %v956_v55, %v941_v53 }
 0xf9d   :  { %v962_v58 = vadd.f32 %v958_v56, %v942_v54  ;;  %v179_v54 = vadd.f32 %v1883_v19, %v94_v50 }
 0xf9e   :  { %1630 = vtanh.f32 %v961_v57  ;;  %v1071_v34 = vrot.slane %v961_v57, 7 }
 0xf9f   :  { %1632 = vtanh.f32 %v962_v58  ;;  %v1072_v35 = vrot.slane %v962_v58, 7 }
 0xfab   :  { %v1631_v59 = vpop.eup %1630 }
 0xfac   :  { %v1633_v60 = vpop.eup %1632  ;;  %967 = vrot.lane.b32.xlu1 %v1631_v59, %s1776_s2  ;;  %v173_v59 = vadd.f32 %v1880_v16, %v94_v50 }
 0xfad   :  { %969 = vrot.lane.b32.xlu0 %v1633_v60, %s1776_s2  ;;  %v1244_v60 = vmul.f32 0.5, %v179_v54 }
 0xfae   :  { %v1243_v12 = vmul.f32 0.5, %v173_v59 }
0x101e   :  { %v968_v61 = vpop.permute.xlu1 %967 }
0x101f   :  { %v970_v62 = vpop.permute.xlu0 %969  ;;  %v973_v63 = vmul.f32 %v968_v61, %v933_v45 }
0x1020   :  { %v974_v1 = vmul.f32 %v970_v62, %v934_v46 }
0x1021   :  { %v977_v2 = vrot.slane %v973_v63, 5 }
0x1022   :  { %v978_v3 = vrot.slane %v974_v1, 4 }
0x1024   :  { %v979_v4 = vsel %vm310_vm2, %v978_v3, %v977_v2 }
0x1025   :  { %980 = vrot.lane.b32.xlu1 %v979_v4, %s1777_s19 }
0x1097   :  { %v981_v6 = vpop.permute.xlu1 %980 }
0x1098   :  { %1540 = vmatmul.mubr.msk.f32.vlgmr.msra.gmra.mxu1 %vm185_vm3, %v981_v6 }
0x1099   :  { %1569 = vmatprep.mubr.msk.f32.mxu1 %vm1775_vm0, %v1774_v0 }
0x1158   :  { %v1050_v8 = vpop.f32.mrf.mxu1 }
0x1159   :  { %v1055_v11 = vrot.slane %v1050_v8, 2  ;;  %v1056_v13 = vrot.slane %v1050_v8, 3 }
0x115a   :  { %v1541_v14 = vpop.f32.mrf.mxu1 }
0x115b   :  { %v1059_v17 = vadd.f32 %v1055_v11, %v1885_v21  ;;  %v1060_v18 = vadd.f32 %v1056_v13, %v1887_v22 }
0x115d   :  { %v1061_v20 = vmul.f32 0.5, %v1059_v17  ;;  %v1062_v23 = vmul.f32 0.5, %v1060_v18 }
0x115f   :  { %1634 = vtanh.f32 %v1061_v20 }
0x1160   :  { %1636 = vtanh.f32 %v1062_v23 }
0x116c   :  { %v1635_v24 = vpop.eup %1634 }
0x116d   :  { %v1637_v25 = vpop.eup %1636  ;;  %1079 = vrot.lane.b32.xlu0 %v1635_v24, %s1776_s2  ;;  %v1065_v26 = vadd.f32 1.0, %v1635_v24 }
0x116e   :  { %1081 = vrot.lane.b32.xlu1 %v1637_v25, %s1776_s2  ;;  %v1066_v27 = vadd.f32 1.0, %v1637_v25 }
0x116f   :  { %v1067_v28 = vmul.f32 0.5, %v1065_v26 }
0x1170   :  { %v1068_v29 = vmul.f32 0.5, %v1066_v27 }
0x1171   :  { %v1075_v36 = vmul.f32 %v1071_v34, %v1067_v28  ;;  %v1299_v34 = vld [vmem:[#allocation8 + $0x30] sm:$0xff] }
0x1172   :  { %v1076_v37 = vmul.f32 %v1072_v35, %v1068_v29 }
0x11df   :  { %v1080_v30 = vpop.permute.xlu0 %1079 }
0x11e0   :  { %v1082_v31 = vpop.permute.xlu1 %1081  ;;  %v1085_v32 = vmul.f32 %v1080_v30, %v1067_v28 }
0x11e1   :  { %v1086_v33 = vmul.f32 %v1082_v31, %v1068_v29 }
0x11e2   :  { %1089 = vrot.lane.b32.xlu0 %v1085_v32, %s1777_s19 }
0x11e3   :  { %1091 = vrot.lane.b32.xlu1 %v1086_v33, %s1777_s19  ;;  %v1300_v33 = vld [vmem:[#allocation8 + $0x38] sm:$0xff] }
0x11e4   :  { %1554 = vmatpush3.msra.mxu1 %v1300_v33 }
0x11e5   :  { %1555 = vmatprep.subr.mxu1 %v1774_v0 }
0x11e6   :  { %1556 = vmatpush3.msra.mxu1 %v1299_v34 }
0x11e7   :  { %1557 = vmatprep.subr.mxu1 %v1774_v0 }
0x1254   :  { %v1090_v38 = vpop.permute.xlu0 %1089 }
0x1255   :  { %v1092_v39 = vpop.permute.xlu1 %1091  ;;  %v2012_v40 = vadd.f32 %v1090_v38, %v1075_v36  ;;  %v1298_v36 = vld [vmem:[#allocation8 + $0x28] sm:$0xff]  ;;  %v1297_v38 = vld [vmem:[#allocation8 + $0x20] sm:$0xff] }
0x1256   :  { %v2014_v5 = vadd.f32 %v1092_v39, %v1076_v37  ;;  %1558 = vmatpush3.msra.mxu1 %v1298_v36  ;;  %v1296_v39 = vld [vmem:[#allocation8 + $0x18] sm:$0xff] }
0x1257   :  { %1638 = vtanh.f32 %v2012_v40  ;;  %1559 = vmatprep.subr.mxu1 %v1774_v0 }
0x1258   :  { %1640 = vtanh.f32 %v2014_v5  ;;  %v1206_v25 = vrot.slane %v2014_v5, 7  ;;  %1560 = vmatpush3.msra.mxu1 %v1297_v38  ;;  %v1294_v5 = vld [vmem:[#allocation8 + $0x8] sm:$0xff] }
0x1259   :  { %1561 = vmatprep.subr.mxu1 %v1774_v0 }
0x125a   :  { %1562 = vmatpush3.msra.mxu1 %v1296_v39 }
0x125b   :  { %1563 = vmatprep.subr.mxu1 %v1774_v0 }
0x1264   :  { %v1639_v41 = vpop.eup %1638 }
0x1265   :  { %v1641_v42 = vpop.eup %1640  ;;  %1101 = vrot.lane.b32.xlu0 %v1639_v41, %s1776_s2  ;;  %v1293_v41 = vld [vmem:[#allocation8] sm:$0xff] }
0x1266   :  { %1103 = vrot.lane.b32.xlu1 %v1641_v42, %s1776_s2 }
0x12d7   :  { %v1102_v43 = vpop.permute.xlu0 %1101 }
0x12d8   :  { %v1104_v7 = vpop.permute.xlu1 %1103  ;;  %v1107_v44 = vmul.f32 %v1102_v43, %v1067_v28  ;;  %v1205_v28 = vrot.slane %v2012_v40, 7  ;;  %v1295_v40 = vld [vmem:[#allocation8 + $0x10] sm:$0xff] }
0x12d9   :  { %v1108_v9 = vmul.f32 %v1104_v7, %v1068_v29  ;;  %1564 = vmatpush3.msra.mxu1 %v1295_v40 }
0x12da   :  { %v1111_v10 = vrot.slane %v1107_v44, 6  ;;  %1565 = vmatprep.subr.mxu1 %v1774_v0 }
0x12db   :  { %v1112_v45 = vrot.slane %v1108_v9, 5  ;;  %1566 = vmatpush3.msra.mxu1 %v1294_v5 }
0x12dc   :  { %1567 = vmatprep.subr.mxu1 %v1774_v0 }
0x12dd   :  { %v1113_v46 = vsel %vm310_vm2, %v1112_v45, %v1111_v10  ;;  %1568 = vmatpush3.msra.mxu1 %v1293_v41 }
0x12de   :  { %1114 = vrot.lane.b32.xlu0 %v1113_v46, %s1777_s19 }
0x1350   :  { %v1115_v47 = vpop.permute.xlu0 %1114 }
0x1351   :  { %1551 = vmatmul.mubr.msk.f32.vlgmr.msra.gmra.mxu0 %vm185_vm3, %v1115_v47 }
0x1411   :  { %v1184_v49 = vpop.f32.mrf.mxu0 }
0x1412   :  { %v1189_v51 = vrot.slane %v1184_v49, 1  ;;  %v1190_v52 = vrot.slane %v1184_v49, 2 }
0x1413   :  { %v1552_v53 = vpop.f32.mrf.mxu0 }
0x1414   :  { %v1193_v55 = vadd.f32 %v1189_v51, %v1885_v21  ;;  %v1194_v56 = vadd.f32 %v1190_v52, %v1887_v22 }
0x1416   :  { %v1195_v57 = vmul.f32 0.5, %v1193_v55  ;;  %v1196_v58 = vmul.f32 0.5, %v1194_v56 }
0x1418   :  { %1642 = vtanh.f32 %v1195_v57  ;;  %v1414_v57 = vld [vmem:[%s2063_s5] ss:$0 sm:$0xff] }
0x1419   :  { %1644 = vtanh.f32 %v1196_v58 }
0x141a   :  { %1646 = vtanh.f32 %v1244_v60 }
0x141b   :  { %1648 = vtanh.f32 %v1243_v12 }
0x1425   :  { %v1643_v15 = vpop.eup %1642 }
0x1426   :  { %v1645_v61 = vpop.eup %1644  ;;  %1213 = vrot.lane.b32.xlu0 %v1643_v15, %s1776_s2  ;;  %v1199_v1 = vadd.f32 1.0, %v1643_v15 }
0x1427   :  { %1215 = vrot.lane.b32.xlu1 %v1645_v61, %s1776_s2  ;;  %v1647_v19 = vpop.eup %1646  ;;  %v1200_v22 = vadd.f32 1.0, %v1645_v61 }
0x1428   :  { %v1649_v21 = vpop.eup %1648  ;;  %v1248_v16 = vadd.f32 1.0, %v1647_v19  ;;  %v1201_v8 = vmul.f32 0.5, %v1199_v1 }
0x1429   :  { %v1202_v62 = vmul.f32 0.5, %v1200_v22  ;;  %v1247_v6 = vadd.f32 1.0, %v1649_v21 }
0x142a   :  { %1255 = vrot.lane.b32.xlu0 %v1647_v19, %s1776_s2  ;;  %v1250_v4 = vmul.f32 0.5, %v1248_v16  ;;  %v1209_v30 = vmul.f32 %v1205_v28, %v1201_v8 }
0x142b   :  { %v1249_v17 = vmul.f32 0.5, %v1247_v6  ;;  %v1210_v26 = vmul.f32 %v1206_v25, %v1202_v62 }
0x142e   :  { %1253 = vrot.lane.b32.xlu0 %v1649_v21, %s1776_s2 }
0x1498   :  { %v1214_v63 = vpop.permute.xlu0 %1213 }
0x1499   :  { %v1216_v2 = vpop.permute.xlu1 %1215  ;;  %v1219_v14 = vmul.f32 %v1214_v63, %v1201_v8 }
0x149a   :  { %v1220_v3 = vmul.f32 %v1216_v2, %v1202_v62 }
0x149c   :  { %1225 = vrot.lane.b32.xlu1 %v1220_v3, %s1777_s19  ;;  %v1256_v11 = vpop.permute.xlu0 %1255 }
0x149d   :  { %v1260_v13 = vmul.f32 %v1256_v11, %v1250_v4 }
0x149f   :  { %1650 = vtanh.f32 %v1260_v13 }
0x14a0   :  { %1223 = vrot.lane.b32.xlu1 %v1219_v14, %s1777_s19  ;;  %v1254_v18 = vpop.permute.xlu0 %1253 }
0x14a1   :  { %v1259_v20 = vmul.f32 %v1254_v18, %v1249_v17 }
0x14a3   :  { %1652 = vtanh.f32 %v1259_v20 }
0x14ac   :  { %v1651_v23 = vpop.eup %1650 }
0x14ad   :  { %1267 = vrot.lane.b32.xlu0 %v1651_v23, %s1778_s20 }
0x14b0   :  { %v1653_v24 = vpop.eup %1652 }
0x14b1   :  { %1265 = vrot.lane.b32.xlu0 %v1653_v24, %s1778_s20 }
0x150e   :  { %v1226_v27 = vpop.permute.xlu1 %1225 }
0x150f   :  { %v1230_v29 = vadd.f32 %v1226_v27, %v1210_v26 }
0x1511   :  { %1654 = vtanh.f32 %v1230_v29 }
0x1512   :  { %v1224_v31 = vpop.permute.xlu1 %1223 }
0x1513   :  { %v1229_v32 = vadd.f32 %v1224_v31, %v1209_v30 }
0x1515   :  { %1656 = vtanh.f32 %v1229_v32 }
0x151e   :  { %v1655_v35 = vpop.eup %1654 }
0x151f   :  { %1237 = vrot.lane.b32.xlu1 %v1655_v35, %s1776_s2  ;;  %v1268_v42 = vpop.permute.xlu0 %1267 }
0x1520   :  { %v1272_v44 = vmul.f32 %v1268_v42, %v1250_v4 }
0x1522   :  { %v1657_v37 = vpop.eup %1656  ;;  %v1284_v47 = vrot.slane %v1272_v44, 7 }
0x1523   :  { %1235 = vrot.lane.b32.xlu1 %v1657_v37, %s1776_s2  ;;  %v1266_v46 = vpop.permute.xlu0 %1265 }
0x1524   :  { %v1271_v48 = vmul.f32 %v1266_v46, %v1249_v17 }
0x1591   :  { %v1238_v43 = vpop.permute.xlu1 %1237 }
0x1592   :  { %v1242_v7 = vmul.f32 %v1238_v43, %v1202_v62 }
0x1594   :  { %v1275_v9 = vrot.slane %v1242_v7, 7 }
0x1595   :  { %v1236_v10 = vpop.permute.xlu1 %1235 }
0x1596   :  { %v1241_v45 = vmul.f32 %v1236_v10, %v1201_v8  ;;  %1278 = vrot.lane.b32.xlu0 %v1275_v9, %s1777_s19 }
0x1598   :  { %1276 = vrot.lane.b32.xlu1 %v1241_v45, %s1777_s19 }
0x159a   :  { %1287 = vrot.lane.b32.xlu0 %v1284_v47, %s1776_s2 }
0x159c   :  { %1285 = vrot.lane.b32.xlu1 %v1271_v48, %s1776_s2 }
0x1608   :  { %v1279_v49 = vpop.permute.xlu0 %1278 }
0x160a   :  { %v1277_v50 = vpop.permute.xlu1 %1276 }
0x160c   :  { %v1288_v0 = vpop.permute.xlu0 %1287 }
0x160d   :  { %v1292_v51 = vsel %vm185_vm3, %v1279_v49, %v1288_v0 }
0x160e   :  { %v1286_v52 = vpop.permute.xlu1 %1285  ;;  %v1312_v54 = vrot.slane %v1292_v51, 7 }
0x160f   :  { %v1291_v53 = vsel %vm185_vm3, %v1277_v50, %v1286_v52 }
0x1610   :  { %v1311_v55 = vrot.slane %v1291_v53, 7 }
0x1612   :  { %v1313_v56 = vsel %vm1310_vm4, %v1311_v55, %v1312_v54 }
0x1613   :  { %1570 = vmatmul.mubr.msk.f32.vlgmr.msra.gmra.mxu1 %vm1314_vm5, %v1313_v56 }
0x16d3   :  { %v1383_v58 = vpop.f32.mrf.mxu1 }
0x16d4   :  { %v1384_v59 = vadd.f32 %v1414_v57, %v1383_v58 }
0x16d5   :  { %v1571_v60 = vpop.f32.mrf.mxu1 }
0x16d6   :  { %1387 = vst [vmem:[#allocation10] sm:$0x3] %v1384_v59 }
0x16d7   :  { %1749 = shalt.err (!%p1746_p10)
}
0x16d8   :  { %1397 = dma.vmem_to_hbm [thread:$0]  %s1395_s24, 32, %s2064_s6, [#allocation4]  }
0x16d9   :  { %1764 = dma.done.wait [#allocation4], 32  }
0x16da   :  { %1765 = vsyncadd [#allocation4], 4294967264 }
0x16db   :  { %1401 = vsyncpa [#allocation3], 1 }
0x16dc   :  { %1402 = vsyncpa [#allocation6], 1 }
0x16dd   :  { %1403 = vsyncpa [#allocation9], 1 }
0x16de   :  { %1404 = vsyncpa [#allocation4], 1 }

</bundles_post_ra>
